<compile_context>
chip_gen: v7x
topology: tpu7x:2x2x1
jax: 0.10.0
libtpu: 0.0.40
codegen_flags: <defaults>
</compile_context>

<pallas_src>
import jax
import jax.numpy as jnp
import numpy as np
from jax import lax
from jax.experimental import pallas as pl
from jax.experimental.pallas import tpu as pltpu

# ---------------- synthetic "config" (small but TPU-layout-friendly shapes) ----
VOCAB_SIZE = 64
HIDDEN = 128                     # lane-dense (multiple of 128)
MAX_POS = 128                    # >= SEQ below
TYPE_VOCAB_SIZES = (3, 4, 5)     # config.type_vocab_size (list of token-type vocabs)
PAD_TOKEN_ID = 0
LN_EPS = 1e-12
BATCH = 2
SEQ = 128

TILE_N = 128                     # token rows per grid step (fills MXU M)
NUM_TABLES = 2 + len(TYPE_VOCAB_SIZES)   # word + position + token-type tables


def _round_up(x, m):
    return ((x + m - 1) // m) * m


# Row offsets of each sub-table inside the stacked table (disjoint ranges).
_OFFSETS = []
_off = 0
for _v in (VOCAB_SIZE, MAX_POS, *TYPE_VOCAB_SIZES):
    _OFFSETS.append(_off)
    _off += _v
OFFSETS = tuple(_OFFSETS)
SUMV = _off                                  # 64 + 128 + 3 + 4 + 5 = 204
SUMV_PAD = _round_up(SUMV, 128)              # 256 (MXU K-tile multiple)


# ---------------- kernel --------------------------------------------------------
def tapas_emb_kernel(ids_ref,      # (TILE_N, NUM_TABLES) int32, ids already row-offset
                     tab_ref,      # (SUMV_PAD, H) f32, stacked word+pos+token-type table
                     gamma_ref,    # (1, H) f32
                     beta_ref,     # (1, H) f32
                     out_ref):     # (TILE_N, H) f32
    # 1) Build one multi-hot matrix covering ALL lookups (word, position, token
    #    types) — the sub-table row ranges are disjoint, so a single MXU matmul
    #    performs every gather+add at once.
    sid = ids_ref[...]                                              # (TILE_N, T)
    iota = lax.broadcasted_iota(jnp.int32, (TILE_N, SUMV_PAD), 1)
    mh_i = (sid[:, 0:1] == iota).astype(jnp.int32)
    for t in range(1, NUM_TABLES):
        mh_i = mh_i + (sid[:, t:t + 1] == iota).astype(jnp.int32)
    mh = mh_i.astype(jnp.float32)                                   # (TILE_N, SUMV_PAD)

    emb = jnp.dot(mh, tab_ref[...], preferred_element_type=jnp.float32)  # (TILE_N, H)

    # 2) Fused single-pass LayerNorm over the lane (hidden) axis:
    #    sum(x) and sum(x*x) together, var = E[x^2] - mean^2, rsqrt on the EUP.
    inv_h = 1.0 / HIDDEN
    s1 = jnp.sum(emb, axis=-1, keepdims=True)
    s2 = jnp.sum(emb * emb, axis=-1, keepdims=True)
    mean = s1 * inv_h
    var = jnp.maximum(s2 * inv_h - mean * mean, 0.0)
    inv_std = lax.rsqrt(var + LN_EPS)
    out_ref[...] = (emb - mean) * inv_std * gamma_ref[...] + beta_ref[...]
    # Dropout is the identity in eval / inference mode.
    # TODO(synk): training-mode dropout (hidden_dropout_prob) not implemented.


# ---------------- wrapper -------------------------------------------------------
def tapas_embeddings(input_ids, token_type_ids=None, position_ids=None, params=None):
    """Flatten (B, S) -> token rows, run one fused, tiled Pallas kernel."""
    b, s = input_ids.shape
    n = b * s

    if position_ids is None:
        position_ids = jnp.broadcast_to(jnp.arange(s, dtype=jnp.int32)[None, :], (b, s))
    if token_type_ids is None:
        token_type_ids = jnp.zeros((b, s, len(TYPE_VOCAB_SIZES)), jnp.int32)

    # Per-lookup ids, pre-offset into the stacked table's disjoint row ranges.
    # (Out-of-range ids silently contribute zero rather than erroring like PyTorch.)
    cols = [input_ids.reshape(n).astype(jnp.int32) + OFFSETS[0],
            position_ids.reshape(n).astype(jnp.int32) + OFFSETS[1]]
    for t in range(len(TYPE_VOCAB_SIZES)):
        cols.append(token_type_ids[..., t].reshape(n).astype(jnp.int32) + OFFSETS[2 + t])
    all_ids = jnp.stack(cols, axis=-1)                      # (N, NUM_TABLES)

    # Pad token rows to a multiple of 2*TILE_N: grid >= 2 and even so v7x's two
    # TensorCores split the "parallel" axis evenly.  Padded rows are sliced off.
    n_pad = _round_up(max(n, 2 * TILE_N), 2 * TILE_N)
    if n_pad != n:
        all_ids = jnp.pad(all_ids, ((0, n_pad - n), (0, 0)))

    # Stacked table (word + position + token types), zero-padded to SUMV_PAD rows.
    stacked = jnp.concatenate([params["word"], params["pos"], *params["tt_tables"]],
                              axis=0)
    stacked = jnp.pad(stacked, ((0, SUMV_PAD - SUMV), (0, 0)))   # (SUMV_PAD, H)

    gamma2d = params["gamma"].reshape(1, HIDDEN)
    beta2d = params["beta"].reshape(1, HIDDEN)

    grid = (n_pad // TILE_N,)

    grid_spec = pltpu.PrefetchScalarGridSpec(
        num_scalar_prefetch=0,
        grid=grid,
        in_specs=[
            pl.BlockSpec((TILE_N, NUM_TABLES), lambda i: (i, 0)),    # ids (tiled)
            pl.BlockSpec((SUMV_PAD, HIDDEN), lambda i: (0, 0)),      # stacked table (resident)
            pl.BlockSpec((1, HIDDEN), lambda i: (0, 0)),             # gamma (resident)
            pl.BlockSpec((1, HIDDEN), lambda i: (0, 0)),             # beta (resident)
        ],
        out_specs=pl.BlockSpec((TILE_N, HIDDEN), lambda i: (i, 0)),
    )

    cost = pl.CostEstimate(
        flops=2 * n_pad * SUMV_PAD * HIDDEN + 10 * n_pad * HIDDEN,
        transcendentals=n_pad,
        bytes_accessed=(n_pad * HIDDEN * 4                # output
                        + n_pad * NUM_TABLES * 4          # ids
                        + SUMV_PAD * HIDDEN * 4),         # stacked table (read once)
    )

    out = pl.pallas_call(
        tapas_emb_kernel,
        out_shape=jax.ShapeDtypeStruct((n_pad, HIDDEN), jnp.float32),
        grid_spec=grid_spec,
        compiler_params=pltpu.CompilerParams(
            dimension_semantics=("parallel",),   # v7x: split token tiles across 2 TCs
        ),
        cost_estimate=cost,
    )(all_ids, stacked, gamma2d, beta2d)

    return out[:n].reshape(b, s, HIDDEN)


# ---------------- pure-JAX reference -------------------------------------------
def reference(input_ids, token_type_ids, position_ids, params):
    emb = params["word"][input_ids] + params["pos"][position_ids]
    for i, tab in enumerate(params["tt_tables"]):
        emb = emb + tab[token_type_ids[..., i]]
    mean = emb.mean(-1, keepdims=True)
    var = ((emb - mean) ** 2).mean(-1, keepdims=True)
    return (emb - mean) / jnp.sqrt(var + LN_EPS) * params["gamma"] + params["beta"]


def init_params(key):
    keys = jax.random.split(key, 3 + len(TYPE_VOCAB_SIZES))
    word = 0.02 * jax.random.normal(keys[0], (VOCAB_SIZE, HIDDEN), jnp.float32)
    # nn.Embedding(padding_idx=pad_token_id) zeroes the padding row at init
    word = word.at[PAD_TOKEN_ID].set(0.0)
    pos = 0.02 * jax.random.normal(keys[1], (MAX_POS, HIDDEN), jnp.float32)
    tt_tables = tuple(
        0.02 * jax.random.normal(keys[2 + i], (v, HIDDEN), jnp.float32)
        for i, v in enumerate(TYPE_VOCAB_SIZES)
    )
    gamma = jnp.ones((HIDDEN,), jnp.float32)   # LayerNorm weight
    beta = jnp.zeros((HIDDEN,), jnp.float32)   # LayerNorm bias
    return {"word": word, "pos": pos, "tt_tables": tt_tables,
            "gamma": gamma, "beta": beta}


if __name__ == "__main__":
    key = jax.random.PRNGKey(0)
    pkey, ikey, tkey = jax.random.split(key, 3)

    params = init_params(pkey)

    input_ids = jax.random.randint(ikey, (BATCH, SEQ), 0, VOCAB_SIZE, dtype=jnp.int32)
    position_ids = jnp.broadcast_to(jnp.arange(SEQ, dtype=jnp.int32)[None, :], (BATCH, SEQ))
    tt_keys = jax.random.split(tkey, len(TYPE_VOCAB_SIZES))
    token_type_ids = jnp.stack(
        [jax.random.randint(k, (BATCH, SEQ), 0, v, dtype=jnp.int32)
         for k, v in zip(tt_keys, TYPE_VOCAB_SIZES)],
        axis=-1,
    )

    out = tapas_embeddings(input_ids, token_type_ids, position_ids, params)
    out = jax.block_until_ready(out)

    ref = reference(input_ids, token_type_ids, position_ids, params)
    np.testing.assert_allclose(np.asarray(out), np.asarray(ref), rtol=1e-5, atol=1e-5)

    print("KERNEL_OK")
</pallas_src>

<mosaic_0001>
module attributes {stable_mosaic.version = 11 : i64} {
  func.func @tapas_emb_kernel(%arg0: i32, %arg1: memref<128x5xi32, #tpu.memory_space<vmem>>, %arg2: memref<256x128xf32, #tpu.memory_space<vmem>>, %arg3: memref<1x128xf32, #tpu.memory_space<vmem>>, %arg4: memref<1x128xf32, #tpu.memory_space<vmem>>, %arg5: memref<128x128xf32, #tpu.memory_space<vmem>>) attributes {dimension_semantics = [#tpu.dimension_semantics<parallel>], iteration_bounds = array<i64: 2>, scalar_prefetch = 0 : i64, scratch_operands = 0 : i64, tpu.core_type = #tpu.core_type<tc>, window_params = [{transform_indices = @transform_0, window_bounds = array<i64: 128, 5>}, {pipeline_mode = #tpu.pipeline_mode<synchronous>, transform_indices = @transform_1, window_bounds = array<i64: 256, 128>}, {pipeline_mode = #tpu.pipeline_mode<synchronous>, transform_indices = @transform_2, window_bounds = array<i64: 1, 128>}, {pipeline_mode = #tpu.pipeline_mode<synchronous>, transform_indices = @transform_3, window_bounds = array<i64: 1, 128>}, {transform_indices = @transform_4, window_bounds = array<i64: 128, 128>}]} {
    %c0 = arith.constant 0 : index
    %c0_0 = arith.constant 0 : index
    %0 = vector.load %arg1[%c0, %c0_0] : memref<128x5xi32, #tpu.memory_space<vmem>>, vector<128x5xi32>
    %1 = tpu.iota {dimensions = array<i32: 1>} : vector<128x256xi32>
    %2 = vector.extract_strided_slice %0 {offsets = [0, 0], sizes = [128, 1], strides = [1, 1]} : vector<128x5xi32> to vector<128x1xi32>
    %3 = vector.broadcast %2 : vector<128x1xi32> to vector<128x256xi32>
    %4 = arith.cmpi eq, %3, %1 : vector<128x256xi32>
    %5 = arith.extui %4 : vector<128x256xi1> to vector<128x256xi32>
    %6 = vector.extract_strided_slice %0 {offsets = [0, 1], sizes = [128, 1], strides = [1, 1]} : vector<128x5xi32> to vector<128x1xi32>
    %7 = vector.broadcast %6 : vector<128x1xi32> to vector<128x256xi32>
    %8 = arith.cmpi eq, %7, %1 : vector<128x256xi32>
    %9 = arith.extui %8 : vector<128x256xi1> to vector<128x256xi32>
    %10 = arith.addi %5, %9 : vector<128x256xi32>
    %11 = vector.extract_strided_slice %0 {offsets = [0, 2], sizes = [128, 1], strides = [1, 1]} : vector<128x5xi32> to vector<128x1xi32>
    %12 = vector.broadcast %11 : vector<128x1xi32> to vector<128x256xi32>
    %13 = arith.cmpi eq, %12, %1 : vector<128x256xi32>
    %14 = arith.extui %13 : vector<128x256xi1> to vector<128x256xi32>
    %15 = arith.addi %10, %14 : vector<128x256xi32>
    %16 = vector.extract_strided_slice %0 {offsets = [0, 3], sizes = [128, 1], strides = [1, 1]} : vector<128x5xi32> to vector<128x1xi32>
    %17 = vector.broadcast %16 : vector<128x1xi32> to vector<128x256xi32>
    %18 = arith.cmpi eq, %17, %1 : vector<128x256xi32>
    %19 = arith.extui %18 : vector<128x256xi1> to vector<128x256xi32>
    %20 = arith.addi %15, %19 : vector<128x256xi32>
    %21 = vector.extract_strided_slice %0 {offsets = [0, 4], sizes = [128, 1], strides = [1, 1]} : vector<128x5xi32> to vector<128x1xi32>
    %22 = vector.broadcast %21 : vector<128x1xi32> to vector<128x256xi32>
    %23 = arith.cmpi eq, %22, %1 : vector<128x256xi32>
    %24 = arith.extui %23 : vector<128x256xi1> to vector<128x256xi32>
    %25 = arith.addi %20, %24 : vector<128x256xi32>
    %26 = arith.sitofp %25 : vector<128x256xi32> to vector<128x256xf32>
    %c0_1 = arith.constant 0 : index
    %c0_2 = arith.constant 0 : index
    %27 = vector.load %arg2[%c0_1, %c0_2] : memref<256x128xf32, #tpu.memory_space<vmem>>, vector<256x128xf32>
    %cst = arith.constant dense<0.000000e+00> : vector<128x128xf32>
    %28 = tpu.matmul %26, %27, %cst {dimension_numbers = #tpu.dot_dimension_numbers<[1], [0], [0], [1], [0, 0, 1, 1], [], []>} : vector<128x256xf32>, vector<256x128xf32>, vector<128x128xf32> -> vector<128x128xf32>
    %cst_3 = arith.constant dense<0.000000e+00> : vector<128xf32>
    %29 = vector.multi_reduction <add>, %28, %cst_3 [1] : vector<128x128xf32> to vector<128xf32>
    %30 = vector.shape_cast %29 : vector<128xf32> to vector<128x1xf32>
    %31 = arith.mulf %28, %28 : vector<128x128xf32>
    %cst_4 = arith.constant dense<0.000000e+00> : vector<128xf32>
    %32 = vector.multi_reduction <add>, %31, %cst_4 [1] : vector<128x128xf32> to vector<128xf32>
    %33 = vector.shape_cast %32 : vector<128xf32> to vector<128x1xf32>
    %cst_5 = arith.constant 7.812500e-03 : f32
    %34 = vector.broadcast %cst_5 : f32 to vector<128x1xf32>
    %35 = arith.mulf %30, %34 : vector<128x1xf32>
    %cst_6 = arith.constant 7.812500e-03 : f32
    %36 = vector.broadcast %cst_6 : f32 to vector<128x1xf32>
    %37 = arith.mulf %33, %36 : vector<128x1xf32>
    %38 = arith.mulf %35, %35 : vector<128x1xf32>
    %39 = arith.subf %37, %38 : vector<128x1xf32>
    %cst_7 = arith.constant 0.000000e+00 : f32
    %40 = vector.broadcast %cst_7 : f32 to vector<128x1xf32>
    %41 = arith.maximumf %39, %40 : vector<128x1xf32>
    %cst_8 = arith.constant 9.99999996E-13 : f32
    %42 = vector.broadcast %cst_8 : f32 to vector<128x1xf32>
    %43 = arith.addf %41, %42 : vector<128x1xf32>
    %44 = math.rsqrt %43 : vector<128x1xf32>
    %45 = vector.broadcast %35 : vector<128x1xf32> to vector<128x128xf32>
    %46 = arith.subf %28, %45 : vector<128x128xf32>
    %47 = vector.broadcast %44 : vector<128x1xf32> to vector<128x128xf32>
    %48 = arith.mulf %46, %47 : vector<128x128xf32>
    %c0_9 = arith.constant 0 : index
    %c0_10 = arith.constant 0 : index
    %49 = vector.load %arg3[%c0_9, %c0_10] : memref<1x128xf32, #tpu.memory_space<vmem>>, vector<1x128xf32>
    %50 = vector.broadcast %49 : vector<1x128xf32> to vector<128x128xf32>
    %51 = arith.mulf %48, %50 : vector<128x128xf32>
    %c0_11 = arith.constant 0 : index
    %c0_12 = arith.constant 0 : index
    %52 = vector.load %arg4[%c0_11, %c0_12] : memref<1x128xf32, #tpu.memory_space<vmem>>, vector<1x128xf32>
    %53 = vector.broadcast %52 : vector<1x128xf32> to vector<128x128xf32>
    %54 = arith.addf %51, %53 : vector<128x128xf32>
    %c0_13 = arith.constant 0 : index
    %c0_14 = arith.constant 0 : index
    %55 = vector.load %arg5[%c0_13, %c0_14] : memref<128x128xf32, #tpu.memory_space<vmem>>, vector<128x128xf32>
    tpu.vector_store %arg5[%c0_13, %c0_14], %54 {strides = array<i32>} : memref<128x128xf32, #tpu.memory_space<vmem>>, vector<128x128xf32>,
    return
  }
  func.func @transform_0(%arg0: i32) -> (i32, i32) {
    %c0_i32 = arith.constant 0 : i32
    %c0_i32_0 = arith.constant 0 : i32
    return %arg0, %c0_i32 : i32, i32
  }
  func.func @transform_1(%arg0: i32) -> (i32, i32) {
    %c0_i32 = arith.constant 0 : i32
    %c0_i32_0 = arith.constant 0 : i32
    %c0_i32_1 = arith.constant 0 : i32
    return %c0_i32, %c0_i32_0 : i32, i32
  }
  func.func @transform_2(%arg0: i32) -> (i32, i32) {
    %c0_i32 = arith.constant 0 : i32
    %c0_i32_0 = arith.constant 0 : i32
    %c0_i32_1 = arith.constant 0 : i32
    return %c0_i32, %c0_i32_0 : i32, i32
  }
  func.func @transform_3(%arg0: i32) -> (i32, i32) {
    %c0_i32 = arith.constant 0 : i32
    %c0_i32_0 = arith.constant 0 : i32
    %c0_i32_1 = arith.constant 0 : i32
    return %c0_i32, %c0_i32_0 : i32, i32
  }
  func.func @transform_4(%arg0: i32) -> (i32, i32) {
    %c0_i32 = arith.constant 0 : i32
    %c0_i32_0 = arith.constant 0 : i32
    return %arg0, %c0_i32 : i32, i32
  }
}

</mosaic_0001>

<bundles_post_ra>
// kernel: tpu_custom_call.1
= control target key start
LH: loop header
LB: loop body
LE: loop exit
PB: predicated region body
PF: predicated region fallthrough
CT: control target
= control target key end

     0   :  { %9 = vsyncpa [#allocation3], 0  ;;  %s2934_s0 = inlined_call_operand.vmem [shape: s32[256,5], index: 0, kind: input, shape index: {}]   ;;  %s2935_s1 = inlined_call_operand.vmem [shape: f32[256,128], index: 1, kind: input, shape index: {}]   ;;  %s2936_s2 = inlined_call_operand.vmem [shape: f32[1,128], index: 2, kind: input, shape index: {}]   ;;  %s2937_s3 = inlined_call_operand.vmem [shape: f32[1,128], index: 3, kind: input, shape index: {}]   ;;  %s2938_s4 = inlined_call_operand.hbm [shape: f32[256,128], index: 4, kind: output, shape index: {}]  }
   0x1   :  { %11 = vsyncpa [#allocation3 + $0x1], 0  ;;  %s1841_s15 = smov 0   ;;  %s1843_s16 = smov 0  }
   0x2   :  { %s1845_s17 = smov 0   ;;  %s1847_s18 = smov 0  }
   0x3 LB: > { %s1862_s19 = sadd.s32 4294967295, %s1806_s18   ;;  %s1477_s20 = sadd.s32 4294967294, %s1806_s18   ;;  %s1806_s18 = sphi %s1847_s18, %s2944_s18   ;;  %s1802_s17 = sphi %s1845_s17, %s2943_s17   ;;  %s1798_s16 = sphi %s1843_s16, %s2942_s16   ;;  %s1794_s15 = sphi %s1841_s15, %s2941_s15  }
   0x4   : > { %s1866_s21 = sadd.s32 1, %s1806_s18   ;;  %s113_s22 = sadd.s32 1, %s1802_s17 }
   0x5   : > { %s110_s23 = ssub.s32 %s1806_s18, %s1866_s21  ;;  %p123_p0 = scmp.ne.s32.totalorder %s1802_s17, %s1798_s16 }
   0x6   : > { %p111_p1 = scmp.eq.s32.totalorder %s110_s23, 0  ;;  %p124_p2 = scmp.eq.s32.totalorder %s1862_s19, 1 }
   0x7   : > { %p129_p3 = scmp.ne.s32.totalorder %s1798_s16, %s1794_s15  ;;  %p130_p4 = scmp.eq.s32.totalorder %s1477_s20, 1 }
   0x8   : > { %s1877_s24 = scalar_select %p111_p1, %s1802_s17, %s113_s22  }
   0x9   : > { %p1879_p5 = por %p124_p2, %p123_p0  ;;  %p1883_p6 = por %p130_p4, %p129_p3 }
   0xa   : > { %p1480_p7 = scmp.ge.s32.totalorder %s1806_s18, 1  ;;  %p166_p8 = scmp.lt.s32.totalorder %s1806_s18, 3 }
   0xc   : > { %p167_p9 = pnand %p1480_p7, %p166_p8 }
   0xd   : > { %s1482_s27 = sshll.u32 (!%p167_p9), %s1862_s19, 4  ;;  %v1808_v0 = vmov (!%p167_p9), 3   ;;  %v1809_v1 = vmov (!%p167_p9), 1   ;;  %v1810_v6 = vmov (!%p167_p9), 2   ;;  %v1811_v9 = vmov (!%p167_p9), 0   ;;  %v954_v13 = vld [vmem:[%s2935_s1 + $0x80] sm:$0xff] (!%p167_p9) }
   0xe   : > { %170 = sbr.rel (%p167_p9) target bundleno = 811 (0x32b), region = 36  ;;  %1670 = vset.pattern.permute.xlu0 (!%p167_p9), %v1808_v0  ;;  %1666 = vset.pattern.permute.xlu1 (!%p167_p9), %v1809_v1  ;;  %p193_p10 = scmp.lt.s32.totalorder (!%p167_p9), %s1482_s27, 31  ;;  %v1812_v12 = vmov (!%p167_p9), 4   ;;  %v955_v14 = vld [vmem:[%s2935_s1 + $0x88] sm:$0xff] (!%p167_p9)  ;;  %v938_v16 = vld [vmem:[%s2935_s1] sm:$0xff] (!%p167_p9)  ;;  %v956_v20 = vld [vmem:[%s2935_s1 + $0x90] sm:$0xff] (!%p167_p9) }
   0xf   : > { %v1572_v15 = vpack.c.bf16 (!%p167_p9), %v955_v14, %v954_v13  ;;  %v939_v17 = vld [vmem:[%s2935_s1 + $0x8] sm:$0xff] (!%p167_p9)  ;;  %v957_v21 = vld [vmem:[%s2935_s1 + $0x98] sm:$0xff] (!%p167_p9)  ;;  %v940_v23 = vld [vmem:[%s2935_s1 + $0x10] sm:$0xff] (!%p167_p9)  ;;  %s1491_s12 = sshll.u32 (!%p167_p9), %s1862_s19, 11 }
  0x10   : > { %v1574_v19 = vpack.c.bf16 (!%p167_p9), %v939_v17, %v938_v16  ;;  %v1576_v22 = vpack.c.bf16 (!%p167_p9), %v957_v21, %v956_v20  ;;  %v941_v24 = vld [vmem:[%s2935_s1 + $0x18] sm:$0xff] (!%p167_p9)  ;;  %v958_v27 = vld [vmem:[%s2935_s1 + $0xa0] sm:$0xff] (!%p167_p9)  ;;  %v959_v28 = vld [vmem:[%s2935_s1 + $0xa8] sm:$0xff] (!%p167_p9)  ;;  %s2885_s22 = scalar_lea.hbm (!%p167_p9), %s2938_s4, %s1491_s12 }
  0x11   : > { %1604 = vmatprep.subr.bf16.mxu1 (!%p167_p9), %v1572_v15  ;;  %1573 = vmatprep.subr.bf16.mxu0 (!%p167_p9), %v1572_v15  ;;  %v1578_v26 = vpack.c.bf16 (!%p167_p9), %v941_v24, %v940_v23  ;;  %v1580_v29 = vpack.c.bf16 (!%p167_p9), %v959_v28, %v958_v27  ;;  %v942_v30 = vld [vmem:[%s2935_s1 + $0x20] sm:$0xff] (!%p167_p9)  ;;  %v943_v31 = vld [vmem:[%s2935_s1 + $0x28] sm:$0xff] (!%p167_p9)  ;;  %v960_v34 = vld [vmem:[%s2935_s1 + $0xb0] sm:$0xff] (!%p167_p9)  ;;  %v215_v27 = vlaneseq (!%p167_p9) }
  0x12   : > { %1612 = vmatpush3.bf16.msra.mxu1 (!%p167_p9), %v1574_v19  ;;  %1575 = vmatpush3.bf16.msra.mxu0 (!%p167_p9), %v1574_v19  ;;  %v1582_v33 = vpack.c.bf16 (!%p167_p9), %v943_v31, %v942_v30  ;;  %v961_v35 = vld [vmem:[%s2935_s1 + $0xb8] sm:$0xff] (!%p167_p9)  ;;  %v944_v37 = vld [vmem:[%s2935_s1 + $0x30] sm:$0xff] (!%p167_p9)  ;;  %v962_v40 = vld [vmem:[%s2935_s1 + $0xc0] sm:$0xff] (!%p167_p9) }
  0x13   : > { %1605 = vmatprep.subr.bf16.mxu1 (!%p167_p9), %v1576_v22  ;;  %1577 = vmatprep.subr.bf16.mxu0 (!%p167_p9), %v1576_v22  ;;  %v1584_v36 = vpack.c.bf16 (!%p167_p9), %v961_v35, %v960_v34  ;;  %v945_v38 = vld [vmem:[%s2935_s1 + $0x38] sm:$0xff] (!%p167_p9)  ;;  %v963_v41 = vld [vmem:[%s2935_s1 + $0xc8] sm:$0xff] (!%p167_p9)  ;;  %v946_v43 = vld [vmem:[%s2935_s1 + $0x40] sm:$0xff] (!%p167_p9)  ;;  %v2147_v30 = vand.u32 (!%p167_p9), 127, %v215_v27 }
  0x14   : > { %v1586_v39 = vpack.c.bf16 (!%p167_p9), %v945_v38, %v944_v37  ;;  %v1588_v42 = vpack.c.bf16 (!%p167_p9), %v963_v41, %v962_v40  ;;  %v947_v44 = vld [vmem:[%s2935_s1 + $0x48] sm:$0xff] (!%p167_p9)  ;;  %v964_v46 = vld [vmem:[%s2935_s1 + $0xd0] sm:$0xff] (!%p167_p9)  ;;  %v965_v47 = vld [vmem:[%s2935_s1 + $0xd8] sm:$0xff] (!%p167_p9) }
  0x15   : > { %s2946_s27 = smov (!%p193_p10, %s1482_s27), 31  ;;  %v1590_v45 = vpack.c.bf16 %v947_v44, %v946_v43  ;;  %v1592_v48 = vpack.c.bf16 %v965_v47, %v964_v46  ;;  %v948_v49 = vld [vmem:[%s2935_s1 + $0x50] sm:$0xff]  ;;  %v949_v50 = vld [vmem:[%s2935_s1 + $0x58] sm:$0xff]  ;;  %v966_v52 = vld [vmem:[%s2935_s1 + $0xe0] sm:$0xff] }
  0x16   : > { %s1483_s28 = sshll.u32 %s2946_s27, 3  ;;  %1613 = vmatpush3.bf16.msra.mxu1 %v1578_v26  ;;  %1579 = vmatpush3.bf16.msra.mxu0 %v1578_v26  ;;  %v1594_v51 = vpack.c.bf16 %v949_v50, %v948_v49  ;;  %v967_v53 = vld [vmem:[%s2935_s1 + $0xe8] sm:$0xff]  ;;  %v950_v55 = vld [vmem:[%s2935_s1 + $0x60] sm:$0xff]  ;;  %v968_v58 = vld [vmem:[%s2935_s1 + $0xf0] sm:$0xff]  ;;  %s1813_s27 = smov [#allocation2]  }
  0x17   : > { %s1895_s5 = scalar_lea.vmem %s2934_s0, %s1483_s28  ;;  %1606 = vmatprep.subr.bf16.mxu1 %v1580_v29  ;;  %1581 = vmatprep.subr.bf16.mxu0 %v1580_v29  ;;  %v1596_v54 = vpack.c.bf16 %v967_v53, %v966_v52  ;;  %v951_v56 = vld [vmem:[%s2935_s1 + $0x68] sm:$0xff]  ;;  %v969_v59 = vld [vmem:[%s2935_s1 + $0xf8] sm:$0xff]  ;;  %v952_v61 = vld [vmem:[%s2935_s1 + $0x70] sm:$0xff]  ;;  %s1748_s28 = sshll.u32 %s1813_s27, 4  ;;  %s1749_s28 = int_to_ptr.vmem [resolvable:$false] %s1748_s28 }
  0x18   : > { %v1898_v2 = vld [vmem:[%s1895_s5] sm:$0xff]  ;;  %v1906_v4 = vld [vmem:[%s1895_s5 + $0x50] sm:$0xff]  ;;  %v1912_v5 = vld [vmem:[%s1895_s5 + $0x18] sm:$0xff]  ;;  %v1598_v57 = vpack.c.bf16 %v951_v56, %v950_v55  ;;  %v1600_v60 = vpack.c.bf16 %v969_v59, %v968_v58  ;;  %s1750_s29 = scalar_lea.vmem %s1749_s28, 4096 }
  0x19   : > { %619 = vperm.xlu0 %1670, %v1898_v2   ;;  %331 = vperm.xlu1 %1666, %v1898_v2   ;;  %v1903_v3 = vld [vmem:[%s1895_s5 + $0x40] sm:$0xff]  ;;  %v1918_v7 = vld [vmem:[%s1895_s5 + $0x68] sm:$0xff]  ;;  %v1927_v10 = vld [vmem:[%s1895_s5 + $0x30] sm:$0xff] }
  0x1a   : > { %v1921_v8 = vld [vmem:[%s1895_s5 + $0x8] sm:$0xff]  ;;  %v1951_v18 = vld [vmem:[%s1895_s5 + $0x10] sm:$0xff]  ;;  %v1968_v25 = vld [vmem:[%s1895_s5 + $0x60] sm:$0xff]  ;;  %1614 = vmatpush3.bf16.msra.mxu1 %v1582_v33  ;;  %1583 = vmatpush3.bf16.msra.mxu0 %v1582_v33 }
  0x1b   : > { %v1933_v11 = vld [vmem:[%s1895_s5 + $0x48] sm:$0xff]  ;;  %1607 = vmatprep.subr.bf16.mxu1 %v1584_v36  ;;  %1585 = vmatprep.subr.bf16.mxu0 %v1584_v36  ;;  %v953_v62 = vld [vmem:[%s2935_s1 + $0x78] sm:$0xff] }
  0x1c   : > { %v1985_v32 = vld [vmem:[%s1895_s5 + $0x28] sm:$0xff]  ;;  %v1602_v63 = vpack.c.bf16 %v953_v62, %v952_v61  ;;  %v210_v13 = vld [vmem:[%s1895_s5 + $0x58] sm:$0xff] }
  0x1d   : > { %1676 = vset.pattern.permute.xlu0 %v1809_v1  ;;  %355 = vperm.xlu1 %1666, %v1903_v3  }
  0x1e   : > { %361 = vperm.xlu0 %1676, %v1906_v4   ;;  %1615 = vmatpush3.bf16.msra.mxu1 %v1586_v39 }
  0x1f   : > { %1587 = vmatpush3.bf16.msra.mxu0 %v1586_v39  ;;  %1608 = vmatprep.subr.bf16.mxu1 %v1588_v42  ;;  %v2168_v39 = vld [vmem:[%s1895_s5 + $0x70] sm:$0xff] }
  0x20   : > { %1589 = vmatprep.subr.bf16.mxu0 %v1588_v42 }
  0x21   : > { %1667 = vset.pattern.permute.xlu1 %v1810_v6 }
  0x22   : > { %340 = vperm.xlu0 %1676, %v1912_v5   ;;  %499 = vperm.xlu1 %1667, %v1903_v3  }
  0x23   : > { %1616 = vmatpush3.bf16.msra.mxu1 %v1590_v45  ;;  %1591 = vmatpush3.bf16.msra.mxu0 %v1590_v45 }
  0x24   : > { %1609 = vmatprep.subr.bf16.mxu1 %v1592_v48  ;;  %1593 = vmatprep.subr.bf16.mxu0 %v1592_v48 }
  0x26   : > { %370 = vperm.xlu0 %1676, %v1918_v7   ;;  %1668 = vset.pattern.permute.xlu1 %v1811_v9 }
  0x27   : > { %222 = vperm.xlu1 %1668, %v1921_v8   ;;  %1617 = vmatpush3.bf16.msra.mxu1 %v1594_v51 }
  0x28   : > { %1595 = vmatpush3.bf16.msra.mxu0 %v1594_v51  ;;  %1610 = vmatprep.subr.bf16.mxu1 %v1596_v54 }
  0x29   : > { %1597 = vmatprep.subr.bf16.mxu0 %v1596_v54 }
  0x2a   : > { %349 = vperm.xlu0 %1676, %v1927_v10  }
  0x2b   : > { %1669 = vset.pattern.permute.xlu1 %v1809_v1  ;;  %1618 = vmatpush3.bf16.msra.mxu1 %v1598_v57 }
  0x2c   : > { %334 = vperm.xlu1 %1669, %v1921_v8   ;;  %1599 = vmatpush3.bf16.msra.mxu0 %v1598_v57 }
  0x2d   : > { %1611 = vmatprep.subr.bf16.mxu1 %v1600_v60  ;;  %1601 = vmatprep.subr.bf16.mxu0 %v1600_v60 }
  0x2e   : > { %1696 = vset.pattern.permute.xlu0 %v1812_v12 }
  0x2f   : > { %790 = vperm.xlu0 %1696, %v1933_v11   ;;  %1619 = vmatpush3.bf16.msra.mxu1 %v1602_v63 }
  0x30   : > { %358 = vperm.xlu1 %1669, %v1933_v11   ;;  %1603 = vmatpush3.bf16.msra.mxu0 %v1602_v63 }
  0x33   : > { %769 = vperm.xlu0 %1696, %v1951_v18  }
  0x34   : > { %1671 = vset.pattern.permute.xlu1 %v1808_v0 }
  0x35   : > { %643 = vperm.xlu1 %1671, %v1903_v3  }
  0x37   : > { %799 = vperm.xlu0 %1696, %v1968_v25  }
  0x39   : > { %1672 = vset.pattern.permute.xlu1 %v1810_v6 }
  0x3a   : > { %478 = vperm.xlu1 %1672, %v1921_v8  }
  0x3b   : > { %778 = vperm.xlu0 %1696, %v1985_v32  }
  0x3e   : > { %1673 = vset.pattern.permute.xlu1 %v1812_v12 }
  0x3f   : > { %1700 = vset.pattern.permute.xlu0 %v1811_v9  ;;  %763 = vperm.xlu1 %1673, %v1898_v2  }
  0x40   : > { %219 = vperm.xlu0 %1700, %v1898_v2  }
  0x43   : > { %787 = vperm.xlu1 %1673, %v1903_v3  }
  0x44   : > { %243 = vperm.xlu0 %1700, %v1903_v3   ;;  %v2067_v3 = vld [vmem:[%s1895_s5 + $0x78] sm:$0xff] }
  0x47   : > { %1674 = vset.pattern.permute.xlu1 %v1811_v9 }
  0x48   : > { %246 = vperm.xlu0 %1700, %v1933_v11   ;;  %249 = vperm.xlu1 %1674, %v1906_v4  }
  0x4c   : > { %225 = vperm.xlu0 %1700, %v1951_v18   ;;  %1675 = vset.pattern.permute.xlu1 %v1809_v1 }
  0x4d   : > { %337 = vperm.xlu1 %1675, %v1951_v18  }
  0x50   : > { %255 = vperm.xlu0 %1700, %v1968_v25  }
  0x51   : > { %1677 = vset.pattern.permute.xlu1 %v1808_v0 }
  0x52   : > { %622 = vperm.xlu1 %1677, %v1921_v8  }
  0x54   : > { %234 = vperm.xlu0 %1700, %v1985_v32  }
  0x56   : > { %646 = vperm.xlu1 %1677, %v1933_v11  }
  0x58   : > { %264 = vperm.xlu0 %1700, %v2067_v3  }
  0x5a   : > { %1678 = vset.pattern.permute.xlu1 %v1810_v6 }
  0x5b   : > { %505 = vperm.xlu1 %1678, %v1906_v4  }
  0x5c   : > { %1703 = vset.pattern.permute.xlu0 %v1810_v6 }
  0x5d   : > { %475 = vperm.xlu0 %1703, %v1898_v2   ;;  %v203_v2 = vld [vmem:[%s1895_s5 + $0x20] sm:$0xff] }
  0x5f   : > { %1679 = vset.pattern.permute.xlu1 %v1812_v12 }
  0x60   : > { %766 = vperm.xlu1 %1679, %v1921_v8   ;;  %v2099_v8 = vld [vmem:[%s1895_s5 + $0x38] sm:$0xff]  ;;  %s189_s5 = sand.u32 1, %s1798_s16  }
  0x61   : > { %502 = vperm.xlu0 %1703, %v1933_v11   ;;  %s1481_s8 = sshll.u32 %s189_s5, 7  ;;  %s2893_s23 = scalar_lea.sflag [#allocation3], %s189_s5 }
  0x62   : > { %s2820_s11 = scalar_lea.vmem [#allocation2], %s1481_s8 }
  0x63   : > { %s1415_s13 = sshll.u32 %s2820_s11, 4  ;;  %s2887_s13 = int_to_ptr.vmem [resolvable:$true] %s1415_s13 }
  0x64   : > { %1680 = vset.pattern.permute.xlu1 %v1811_v9  ;;  %s1744_s19 = scalar_lea.vmem %s2887_s13, 2048  ;;  %p1751_p0 = scmp.lt.s32.totalorder %s2887_s13, %s1749_s28 }
  0x65   : > { %481 = vperm.xlu0 %1703, %v1951_v18   ;;  %228 = vperm.xlu1 %1680, %v1912_v5   ;;  %p1745_p11 = scmp.ne.s32.totalorder %s2887_s13, %s1744_s19  ;;  %p1752_p1 = scmp.lt.s32.totalorder %s1750_s29, %s1744_s19 }
  0x67   : > { %p1746_p12 = pnand %p1745_p11, %p1879_p5  ;;  %p1753_p2 = por %p1752_p1, %p1751_p0 }
  0x69   : > { %511 = vperm.xlu0 %1703, %v1968_v25   ;;  %252 = vperm.xlu1 %1680, %v210_v13   ;;  %p1747_p13 = pneg %p1746_p12 }
  0x6b   : > { %p1754_p3 = pnand %p1753_p2, %p1747_p13 }
  0x6d   : > { %490 = vperm.xlu0 %1703, %v1985_v32   ;;  %1681 = vset.pattern.permute.xlu1 %v1809_v1 }
  0x6e   : > { %364 = vperm.xlu1 %1681, %v210_v13  }
  0x71   : > { %520 = vperm.xlu0 %1703, %v2067_v3  }
  0x72   : > { %1682 = vset.pattern.permute.xlu1 %v1808_v0 }
  0x73   : > { %625 = vperm.xlu1 %1682, %v1951_v18  }
  0x75   : > { %1707 = vset.pattern.permute.xlu0 %v1808_v0 }
  0x76   : > { %649 = vperm.xlu0 %1707, %v1906_v4  }
  0x77   : > { %1683 = vset.pattern.permute.xlu1 %v1810_v6 }
  0x78   : > { %484 = vperm.xlu1 %1683, %v1912_v5  }
  0x7a   : > { %628 = vperm.xlu0 %1707, %v1912_v5  }
  0x7c   : > { %508 = vperm.xlu1 %1683, %v210_v13  }
  0x7e   : > { %658 = vperm.xlu0 %1707, %v1918_v7  }
  0x80   : > { %1684 = vset.pattern.permute.xlu1 %v1812_v12 }
  0x81   : > { %793 = vperm.xlu1 %1684, %v1906_v4  }
  0x82   : > { %637 = vperm.xlu0 %1707, %v1927_v10  }
  0x85   : > { %1685 = vset.pattern.permute.xlu1 %v1811_v9 }
  0x86   : > { %231 = vperm.xlu1 %1685, %v203_v2   ;;  %640 = vperm.xlu0 %1707, %v2099_v8  }
  0x8a   : > { %1686 = vset.pattern.permute.xlu1 %v1809_v1  ;;  %1711 = vset.pattern.permute.xlu0 %v1812_v12 }
  0x8b   : > { %343 = vperm.xlu1 %1686, %v203_v2   ;;  %808 = vperm.xlu0 %1711, %v2067_v3  }
  0x8f   : > { %367 = vperm.xlu1 %1686, %v1968_v25  }
  0x93   : > { %1687 = vset.pattern.permute.xlu1 %v1808_v0 }
  0x94   : > { %652 = vperm.xlu1 %1687, %v210_v13  }
  0x98   : > { %1688 = vset.pattern.permute.xlu1 %v1810_v6  ;;  %v2109_v4 = vpop.permute.xlu1 %331  ;;  %v2111_v11 = vpop.permute.xlu0 %619 }
  0x99   : > { %487 = vperm.xlu1 %1688, %v203_v2   ;;  %vm378_vm10 = vcmp.eq.s32.totalorder %v2109_v4, %v2147_v30  ;;  %vm666_vm12 = vcmp.eq.s32.totalorder %v2111_v11, %v2147_v30 }
  0x9c   : > { %v356_v14 = vpop.permute.xlu1 %355 }
  0x9d   : > { %1689 = vset.pattern.permute.xlu1 %v1812_v12  ;;  %v2114_v15 = vpop.permute.xlu0 %361  ;;  %vm394_vm0 = vcmp.eq.s32.totalorder %v356_v14, %v2147_v30 }
  0x9e   : > { %772 = vperm.xlu1 %1689, %v1912_v5   ;;  %v426_v36 = vsel %vm394_vm0, 1, %v1811_v9 }
  0xa1   : > { %v500_v16 = vpop.permute.xlu1 %499  ;;  %v2117_v17 = vpop.permute.xlu0 %340 }
  0xa2   : > { %796 = vperm.xlu1 %1689, %v210_v13   ;;  %vm538_vm2 = vcmp.eq.s32.totalorder %v500_v16, %v2147_v30  ;;  %v410_v13 = vsel %vm378_vm10, 1, %v1811_v9 }
  0xa3   : > { %v570_v42 = vsel %vm538_vm2, 1, %v1811_v9 }
  0xa5   : > { %v2119_v18 = vpop.permute.xlu0 %370 }
  0xa6   : > { %1690 = vset.pattern.permute.xlu1 %v1811_v9  ;;  %v2122_v19 = vpop.permute.xlu1 %222 }
  0xa7   : > { %258 = vperm.xlu1 %1690, %v1918_v7   ;;  %vm268_vm0 = vcmp.eq.s32.totalorder %v2122_v19, %v2147_v30 }
  0xa9   : > { %v2125_v20 = vpop.permute.xlu0 %349 }
  0xab   : > { %1691 = vset.pattern.permute.xlu1 %v1809_v1  ;;  %v2128_v21 = vpop.permute.xlu1 %334 }
  0xac   : > { %346 = vperm.xlu1 %1691, %v1985_v32   ;;  %vm380_vm14 = vcmp.eq.s32.totalorder %v2128_v21, %v2147_v30 }
  0xae   : > { %v2131_v5 = vpop.permute.xlu0 %790 }
  0xaf   : > { %v2133_v22 = vpop.permute.xlu1 %358 }
  0xb0   : > { %1692 = vset.pattern.permute.xlu1 %v1808_v0 }
  0xb1   : > { %631 = vperm.xlu1 %1692, %v203_v2  }
  0xb2   : > { %v2136_v23 = vpop.permute.xlu0 %769 }
  0xb4   : > { %v644_v24 = vpop.permute.xlu1 %643 }
  0xb5   : > { %655 = vperm.xlu1 %1692, %v1968_v25   ;;  %v2155_v25 = vadd.s32 128, %v2147_v30  ;;  %vm682_vm6 = vcmp.eq.s32.totalorder %v644_v24, %v2147_v30 }
  0xb6   : > { %v2139_v26 = vpop.permute.xlu0 %799  ;;  %v714_v48 = vsel %vm682_vm6, 1, %v1811_v9 }
  0xb7   : > { %vm395_vm1 = vcmp.eq.s32.totalorder %v356_v14, %v2155_v25  ;;  %vm539_vm5 = vcmp.eq.s32.totalorder %v500_v16, %v2155_v25  ;;  %vm683_vm7 = vcmp.eq.s32.totalorder %v644_v24, %v2155_v25  ;;  %vm379_vm11 = vcmp.eq.s32.totalorder %v2109_v4, %v2155_v25 }
  0xb8   : > { %v427_v40 = vsel %vm395_vm1, 1, %v1811_v9  ;;  %v571_v47 = vsel %vm539_vm5, 1, %v1811_v9  ;;  %v715_v54 = vsel %vm683_vm7, 1, %v1811_v9  ;;  %vm667_vm13 = vcmp.eq.s32.totalorder %v2111_v11, %v2155_v25 }
  0xb9   : > { %1693 = vset.pattern.permute.xlu1 %v1810_v6  ;;  %v2142_v28 = vpop.permute.xlu1 %478  ;;  %vm381_vm15 = vcmp.eq.s32.totalorder %v2128_v21, %v2155_v25  ;;  %v698_v4 = vsel %vm666_vm12, 1, %v1811_v9  ;;  %vm269_vm1 = vcmp.eq.s32.totalorder %v2122_v19, %v2155_v25  ;;  %v699_v11 = vsel %vm667_vm13, 1, %v1811_v9 }
  0xba   : > { %514 = vperm.xlu1 %1693, %v1918_v7   ;;  %v2145_v29 = vpop.permute.xlu0 %778  ;;  %v412_v14 = vsel %vm380_vm14, 1, %v1811_v9  ;;  %v413_v16 = vsel %vm381_vm15, 1, %v1811_v9  ;;  %v300_v21 = vsel %vm268_vm0, 1, %v1811_v9  ;;  %vm397_vm5 = vcmp.eq.s32.totalorder %v2133_v22, %v2155_v25 }
  0xbb   : > { %vm524_vm6 = vcmp.eq.s32.totalorder %v2142_v28, %v2147_v30  ;;  %vm525_vm7 = vcmp.eq.s32.totalorder %v2142_v28, %v2155_v25  ;;  %v301_v24 = vsel %vm269_vm1, 1, %v1811_v9  ;;  %v429_v28 = vsel %vm397_vm5, 1, %v1811_v9 }
  0xbe   : > { %1694 = vset.pattern.permute.xlu1 %v1812_v12  ;;  %v2150_v31 = vpop.permute.xlu1 %763 }
  0xbf   : > { %v2152_v33 = vpop.permute.xlu0 %219  ;;  %775 = vperm.xlu1 %1694, %v203_v2   ;;  %v411_v2 = vsel %vm379_vm11, 1, %v1811_v9  ;;  %vm810_vm10 = vcmp.eq.s32.totalorder %v2150_v31, %v2147_v30  ;;  %vm811_vm11 = vcmp.eq.s32.totalorder %v2150_v31, %v2155_v25 }
  0xc0   : > { %vm266_vm2 = vcmp.eq.s32.totalorder %v2152_v33, %v2147_v30 }
  0xc1   : > { %v298_v27 = vsel %vm266_vm2, 1, %v1811_v9 }
  0xc2   : > { %v788_v34 = vpop.permute.xlu1 %787 }
  0xc3   : > { %v244_v35 = vpop.permute.xlu0 %243  ;;  %1695 = vset.pattern.permute.xlu1 %v1811_v9  ;;  %vm826_vm8 = vcmp.eq.s32.totalorder %v788_v34, %v2147_v30  ;;  %vm827_vm9 = vcmp.eq.s32.totalorder %v788_v34, %v2155_v25  ;;  %v444_v34 = vadd.s32 %v412_v14, %v300_v21 }
  0xc4   : > { %vm282_vm3 = vcmp.eq.s32.totalorder %v244_v35, %v2147_v30  ;;  %vm283_vm4 = vcmp.eq.s32.totalorder %v244_v35, %v2155_v25  ;;  %237 = vperm.xlu1 %1695, %v1927_v10   ;;  %v858_v53 = vsel %vm826_vm8, 1, %v1811_v9  ;;  %v859_v58 = vsel %vm827_vm9, 1, %v1811_v9 }
  0xc5   : > { %v314_v37 = vsel %vm282_vm3, 1, %v1811_v9  ;;  %v315_v38 = vsel %vm283_vm4, 1, %v1811_v9  ;;  %vm267_vm3 = vcmp.eq.s32.totalorder %v2152_v33, %v2155_v25  ;;  %vm396_vm4 = vcmp.eq.s32.totalorder %v2133_v22, %v2147_v30 }
  0xc6   : > { %v458_v41 = vadd.s32 %v426_v36, %v314_v37  ;;  %v459_v43 = vadd.s32 %v427_v40, %v315_v38  ;;  %v299_v33 = vsel %vm267_vm3, 1, %v1811_v9  ;;  %v445_v35 = vadd.s32 %v413_v16, %v301_v24 }
  0xc7   : > { %v2174_v44 = vpop.permute.xlu0 %246  ;;  %v2176_v45 = vpop.permute.xlu1 %249  ;;  %v428_v36 = vsel %vm396_vm4, 1, %v1811_v9  ;;  %v556_v37 = vsel %vm524_vm6, 1, %v1811_v9  ;;  %v557_v38 = vsel %vm525_vm7, 1, %v1811_v9  ;;  %v442_v40 = vadd.s32 %v410_v13, %v298_v27 }
  0xc8   : > { %v602_v46 = vadd.s32 %v570_v42, %v458_v41  ;;  %261 = vperm.xlu1 %1695, %v2168_v39   ;;  %v603_v50 = vadd.s32 %v571_v47, %v459_v43  ;;  %vm284_vm8 = vcmp.eq.s32.totalorder %v2174_v44, %v2147_v30  ;;  %vm285_vm9 = vcmp.eq.s32.totalorder %v2174_v44, %v2155_v25 }
  0xc9   : > { %v443_v41 = vadd.s32 %v411_v2, %v299_v33  ;;  %v316_v42 = vsel %vm284_vm8, 1, %v1811_v9  ;;  %v317_v44 = vsel %vm285_vm9, 1, %v1811_v9  ;;  %vm828_vm6 = vcmp.eq.s32.totalorder %v2131_v5, %v2147_v30 }
  0xca   : > { %v746_v51 = vadd.s32 %v714_v48, %v602_v46  ;;  %v747_v55 = vadd.s32 %v715_v54, %v603_v50  ;;  %v589_v46 = vadd.s32 %v557_v38, %v445_v35  ;;  %v842_v50 = vsel %vm810_vm10, 1, %v1811_v9 }
  0xcb   : > { %v2183_v49 = vpop.permute.xlu0 %225  ;;  %v843_v54 = vsel %vm811_vm11, 1, %v1811_v9  ;;  %vm829_vm7 = vcmp.eq.s32.totalorder %v2131_v5, %v2155_v25 }
  0xcc   : > { %1697 = vset.pattern.permute.xlu1 %v1809_v1  ;;  %v2186_v52 = vpop.permute.xlu1 %337  ;;  %v890_v56 = vadd.s32 %v858_v53, %v746_v51  ;;  %v891_v59 = vadd.s32 %v859_v58, %v747_v55  ;;  %v460_v55 = vadd.s32 %v428_v36, %v316_v42  ;;  %vm270_vm8 = vcmp.eq.s32.totalorder %v2183_v49, %v2147_v30 }
  0xcd   : > { %373 = vperm.xlu1 %1697, %v2168_v39   ;;  %vm271_vm9 = vcmp.eq.s32.totalorder %v2183_v49, %v2155_v25  ;;  %vm382_vm10 = vcmp.eq.s32.totalorder %v2186_v52, %v2147_v30  ;;  %vm383_vm11 = vcmp.eq.s32.totalorder %v2186_v52, %v2155_v25  ;;  %v302_v52 = vsel %vm270_vm8, 1, %v1811_v9 }
  0xce   : > { %v922_v60 = vcvt.s32.f32 %v890_v56  ;;  %v923_v62 = vcvt.s32.f32 %v891_v59  ;;  %v461_v56 = vadd.s32 %v429_v28, %v317_v44 }
  0xcf   : > { %v2192_v57 = vpop.permute.xlu0 %255 }
  0xd0   : > { %1074 = vmatprep.mubr.f32.mxu1 %v923_v62 }
  0xd1   : > { %1698 = vset.pattern.permute.xlu1 %v1808_v0  ;;  %v2196_v61 = vpop.permute.xlu1 %622  ;;  %1075 = vmatmul.mubr.f32.vlgmr.msra.gmra.mrb[0].mxu1 %v922_v60 }
  0xd2   : > { %634 = vperm.xlu1 %1698, %v1985_v32   ;;  %vm668_vm12 = vcmp.eq.s32.totalorder %v2196_v61, %v2147_v30  ;;  %vm669_vm15 = vcmp.eq.s32.totalorder %v2196_v61, %v2155_v25 }
  0xd3   : > { %v2205_v63 = vpop.permute.xlu0 %234  ;;  %v700_v58 = vsel %vm668_vm12, 1, %v1811_v9  ;;  %v701_v60 = vsel %vm669_vm15, 1, %v1811_v9  ;;  %vm815_vm15 = vcmp.eq.s32.totalorder %v2136_v23, %v2155_v25 }
  0xd4   : > { %v733_v16 = vadd.s32 %v701_v60, %v589_v46 }
  0xd5   : > { %v2217_v32 = vpop.permute.xlu1 %646 }
  0xd6   : > { %1699 = vset.pattern.permute.xlu1 %v1810_v6  ;;  %vm684_vm1 = vcmp.eq.s32.totalorder %v2217_v32, %v2147_v30  ;;  %vm685_vm3 = vcmp.eq.s32.totalorder %v2217_v32, %v2155_v25 }
  0xd7   : > { %493 = vperm.xlu1 %1699, %v1927_v10   ;;  %v2233_v19 = vpop.permute.xlu0 %264  ;;  %v716_v35 = vsel %vm684_vm1, 1, %v1811_v9  ;;  %v717_v36 = vsel %vm685_vm3, 1, %v1811_v9  ;;  %vm399_vm3 = vcmp.eq.s32.totalorder %v2114_v15, %v2155_v25 }
  0xda   : > { %v2250_v22 = vpop.permute.xlu1 %505 }
  0xdb   : > { %517 = vperm.xlu1 %1699, %v2168_v39  }
  0xdc   : > { %v476_v43 = vpop.permute.xlu0 %475 }
  0xdd   : > { %vm522_vm13 = vcmp.eq.s32.totalorder %v476_v43, %v2147_v30  ;;  %vm523_vm14 = vcmp.eq.s32.totalorder %v476_v43, %v2155_v25 }
  0xde   : > { %v554_v47 = vsel %vm522_vm13, 1, %v1811_v9  ;;  %v555_v48 = vsel %vm523_vm14, 1, %v1811_v9  ;;  %vm814_vm14 = vcmp.eq.s32.totalorder %v2136_v23, %v2147_v30 }
  0xdf   : > { %v586_v31 = vadd.s32 %v554_v47, %v442_v40  ;;  %v587_v51 = vadd.s32 %v555_v48, %v443_v41  ;;  %1701 = vset.pattern.permute.xlu1 %v1812_v12  ;;  %v767_v53 = vpop.permute.xlu1 %766  ;;  %v861_v41 = vsel %vm829_vm7, 1, %v1811_v9  ;;  %vm543_vm7 = vcmp.eq.s32.totalorder %v2250_v22, %v2155_v25 }
  0xe0   : > { %vm813_vm0 = vcmp.eq.s32.totalorder %v767_v53, %v2155_v25  ;;  %v503_v59 = vpop.permute.xlu0 %502  ;;  %802 = vperm.xlu1 %1701, %v1918_v7   ;;  %vm812_vm5 = vcmp.eq.s32.totalorder %v767_v53, %v2147_v30 }
  0xe1   : > { %v730_v61 = vadd.s32 %v698_v4, %v586_v31  ;;  %vm540_vm2 = vcmp.eq.s32.totalorder %v503_v59, %v2147_v30  ;;  %vm541_vm4 = vcmp.eq.s32.totalorder %v503_v59, %v2155_v25  ;;  %v731_v13 = vadd.s32 %v699_v11, %v587_v51 }
  0xe2   : > { %v572_v62 = vsel %vm540_vm2, 1, %v1811_v9  ;;  %v845_v7 = vsel %vm813_vm0, 1, %v1811_v9  ;;  %v573_v2 = vsel %vm541_vm4, 1, %v1811_v9  ;;  %v588_v11 = vadd.s32 %v556_v37, %v444_v34 }
  0xe3   : > { %v604_v14 = vadd.s32 %v572_v62, %v460_v55  ;;  %v605_v21 = vadd.s32 %v573_v2, %v461_v56  ;;  %v875_v27 = vadd.s32 %v843_v54, %v731_v13  ;;  %v874_v33 = vadd.s32 %v842_v50, %v730_v61 }
  0xe4   : > { %v482_v4 = vpop.permute.xlu0 %481  ;;  %1702 = vset.pattern.permute.xlu1 %v1811_v9  ;;  %v2288_v24 = vpop.permute.xlu1 %228  ;;  %v844_v28 = vsel %vm812_vm5, 1, %v1811_v9  ;;  %v877_v38 = vadd.s32 %v845_v7, %v733_v16  ;;  %v732_v40 = vadd.s32 %v700_v58, %v588_v11  ;;  %v860_v37 = vsel %vm828_vm6, 1, %v1811_v9 }
  0xe5   : > { %240 = vperm.xlu1 %1702, %v2099_v8   ;;  %v748_v5 = vadd.s32 %v716_v35, %v604_v14  ;;  %v749_v34 = vadd.s32 %v717_v36, %v605_v21  ;;  %v907_v42 = vcvt.s32.f32 %v875_v27  ;;  %v906_v43 = vcvt.s32.f32 %v874_v33 }
  0xe6   : > { %v876_v32 = vadd.s32 %v844_v28, %v732_v40  ;;  %v909_v47 = vcvt.s32.f32 %v877_v38  ;;  %vm526_vm12 = vcmp.eq.s32.totalorder %v482_v4, %v2147_v30  ;;  %vm527_vm13 = vcmp.eq.s32.totalorder %v482_v4, %v2155_v25 }
  0xe7   : > { %1034 = vmatprep.mubr.f32.mxu0 %v907_v42  ;;  %v893_v48 = vadd.s32 %v861_v41, %v749_v34  ;;  %v303_v55 = vsel %vm271_vm9, 1, %v1811_v9  ;;  %v414_v56 = vsel %vm382_vm10, 1, %v1811_v9  ;;  %v415_v58 = vsel %vm383_vm11, 1, %v1811_v9 }
  0xe8   : > { %v2308_v44 = vpop.permute.xlu1 %252  ;;  %v2310_v46 = vpop.permute.xlu0 %511  ;;  %1035 = vmatmul.mubr.f32.vlgmr.msra.gmra.mrb[0].mxu0 %v906_v43  ;;  %v908_v51 = vcvt.s32.f32 %v876_v32  ;;  %v558_v59 = vsel %vm526_vm12, 1, %v1811_v9  ;;  %v559_v60 = vsel %vm527_vm13, 1, %v1811_v9  ;;  %v446_v49 = vadd.s32 %v414_v56, %v302_v52 }
  0xe9   : > { %1704 = vset.pattern.permute.xlu1 %v1809_v1  ;;  %v892_v1 = vadd.s32 %v860_v37, %v748_v5  ;;  %1039 = vmatprep.mubr.f32.mxu0 %v909_v47  ;;  %v925_v31 = vcvt.s32.f32 %v893_v48  ;;  %v447_v61 = vadd.s32 %v415_v58, %v303_v55  ;;  %v846_v14 = vsel %vm814_vm14, 1, %v1811_v9 }
  0xea   : > { %352 = vperm.xlu1 %1704, %v2099_v8   ;;  %v590_v7 = vadd.s32 %v558_v59, %v446_v49  ;;  %v847_v16 = vsel %vm815_vm15, 1, %v1811_v9  ;;  %vm398_vm2 = vcmp.eq.s32.totalorder %v2114_v15, %v2147_v30  ;;  %vm286_vm4 = vcmp.eq.s32.totalorder %v2176_v45, %v2147_v30 }
  0xeb   : > { %v924_v53 = vcvt.s32.f32 %v892_v1  ;;  %1079 = vmatprep.mubr.f32.mxu1 %v925_v31  ;;  %v591_v2 = vadd.s32 %v559_v60, %v447_v61  ;;  %vm287_vm5 = vcmp.eq.s32.totalorder %v2176_v45, %v2155_v25  ;;  %vm542_vm6 = vcmp.eq.s32.totalorder %v2250_v22, %v2147_v30 }
  0xec   : > { %v2323_v50 = vpop.permute.xlu0 %490  ;;  %1040 = vmatmul.mubr.f32.gmra.mrb[2].mxu0 %v908_v51  ;;  %v430_v38 = vsel %vm398_vm2, 1, %v1811_v9  ;;  %v431_v45 = vsel %vm399_vm3, 1, %v1811_v9  ;;  %v319_v40 = vsel %vm287_vm5, 1, %v1811_v9  ;;  %v574_v34 = vsel %vm542_vm6, 1, %v1811_v9 }
  0xed   : > { %v2326_v54 = vpop.permute.xlu1 %364  ;;  %1080 = vmatmul.mubr.f32.gmra.mrb[2].mxu1 %v924_v53  ;;  %v575_v22 = vsel %vm543_vm7, 1, %v1811_v9  ;;  %v463_v41 = vadd.s32 %v431_v45, %v319_v40  ;;  %vm290_vm12 = vcmp.eq.s32.totalorder %v2192_v57, %v2147_v30  ;;  %vm291_vm13 = vcmp.eq.s32.totalorder %v2192_v57, %v2155_v25 }
  0xee   : > { %376 = vperm.xlu1 %1704, %v2067_v3   ;;  %vm546_vm14 = vcmp.eq.s32.totalorder %v2310_v46, %v2147_v30  ;;  %vm547_vm15 = vcmp.eq.s32.totalorder %v2310_v46, %v2155_v25  ;;  %vm272_vm2 = vcmp.eq.s32.totalorder %v2288_v24, %v2147_v30  ;;  %vm273_vm3 = vcmp.eq.s32.totalorder %v2288_v24, %v2155_v25 }
  0xef   : > { %v607_v47 = vadd.s32 %v575_v22, %v463_v41  ;;  %v304_v24 = vsel %vm272_vm2, 1, %v1811_v9 }
  0xf0   : > { %v2345_v62 = vpop.permute.xlu0 %520 }
  0xf2   : > { %1705 = vset.pattern.permute.xlu1 %v1808_v0  ;;  %v626_v13 = vpop.permute.xlu1 %625 }
  0xf3   : > { %vm670_vm0 = vcmp.eq.s32.totalorder %v626_v13, %v2147_v30  ;;  %vm671_vm1 = vcmp.eq.s32.totalorder %v626_v13, %v2155_v25  ;;  %661 = vperm.xlu1 %1705, %v2168_v39   ;;  %v305_v13 = vsel %vm273_vm3, 1, %v1811_v9 }
  0xf4   : > { %v702_v23 = vsel %vm670_vm0, 1, %v1811_v9  ;;  %v703_v21 = vsel %vm671_vm1, 1, %v1811_v9  ;;  %vm384_vm0 = vcmp.eq.s32.totalorder %v2117_v17, %v2147_v30  ;;  %vm385_vm1 = vcmp.eq.s32.totalorder %v2117_v17, %v2155_v25 }
  0xf5   : > { %v734_v4 = vadd.s32 %v702_v23, %v590_v7  ;;  %v735_v27 = vadd.s32 %v703_v21, %v591_v2  ;;  %v650_v36 = vpop.permute.xlu0 %649  ;;  %v416_v49 = vsel %vm384_vm0, 1, %v1811_v9  ;;  %v417_v61 = vsel %vm385_vm1, 1, %v1811_v9 }
  0xf6   : > { %vm686_vm8 = vcmp.eq.s32.totalorder %v650_v36, %v2147_v30  ;;  %vm687_vm9 = vcmp.eq.s32.totalorder %v650_v36, %v2155_v25  ;;  %v448_v23 = vadd.s32 %v416_v49, %v304_v24  ;;  %v449_v21 = vadd.s32 %v417_v61, %v305_v13 }
  0xf7   : > { %1706 = vset.pattern.permute.xlu1 %v1810_v6  ;;  %v2364_v33 = vpop.permute.xlu1 %484  ;;  %v879_v11 = vadd.s32 %v847_v16, %v735_v27  ;;  %v878_v35 = vadd.s32 %v846_v14, %v734_v4  ;;  %v318_v6 = vsel %vm286_vm4, 1, %v1811_v9  ;;  %v718_v42 = vsel %vm686_vm8, 1, %v1811_v9 }
  0xf8   : > { %496 = vperm.xlu1 %1706, %v2099_v8   ;;  %v462_v37 = vadd.s32 %v430_v38, %v318_v6  ;;  %v719_v43 = vsel %vm687_vm9, 1, %v1811_v9  ;;  %vm528_vm6 = vcmp.eq.s32.totalorder %v2364_v33, %v2147_v30  ;;  %vm529_vm7 = vcmp.eq.s32.totalorder %v2364_v33, %v2155_v25 }
  0xf9   : > { %v911_v15 = vcvt.s32.f32 %v879_v11  ;;  %v910_v28 = vcvt.s32.f32 %v878_v35  ;;  %v751_v31 = vadd.s32 %v719_v43, %v607_v47  ;;  %v629_v16 = vpop.permute.xlu0 %628  ;;  %v560_v4 = vsel %vm528_vm6, 1, %v1811_v9 }
  0xfa   : > { %v606_v32 = vadd.s32 %v574_v34, %v462_v37  ;;  %v561_v27 = vsel %vm529_vm7, 1, %v1811_v9  ;;  %vm400_vm8 = vcmp.eq.s32.totalorder %v2326_v54, %v2147_v30  ;;  %vm401_vm9 = vcmp.eq.s32.totalorder %v2326_v54, %v2155_v25 }
  0xfb   : > { %1044 = vmatprep.mubr.f32.mxu0 %v911_v15  ;;  %v2377_v5 = vpop.permute.xlu1 %508  ;;  %v592_v11 = vadd.s32 %v560_v4, %v448_v23  ;;  %v593_v35 = vadd.s32 %v561_v27, %v449_v21  ;;  %v432_v54 = vsel %vm400_vm8, 1, %v1811_v9  ;;  %v433_v36 = vsel %vm401_vm9, 1, %v1811_v9 }
  0xfc   : > { %1708 = vset.pattern.permute.xlu1 %v1812_v12  ;;  %1045 = vmatmul.mubr.f32.gmra.mrb[4].mxu0 %v910_v28  ;;  %v750_v1 = vadd.s32 %v718_v42, %v606_v32  ;;  %vm276_vm6 = vcmp.eq.s32.totalorder %v2205_v63, %v2147_v30  ;;  %vm277_vm7 = vcmp.eq.s32.totalorder %v2205_v63, %v2155_v25 }
  0xfd   : > { %781 = vperm.xlu1 %1708, %v1927_v10   ;;  %vm532_vm8 = vcmp.eq.s32.totalorder %v2323_v50, %v2147_v30  ;;  %vm533_vm9 = vcmp.eq.s32.totalorder %v2323_v50, %v2155_v25 }
  0xfe   : > { %v564_v49 = vsel %vm532_vm8, 1, %v1811_v9  ;;  %v565_v63 = vsel %vm533_vm9, 1, %v1811_v9 }
 0x100   : > { %v794_v48 = vpop.permute.xlu1 %793 }
 0x101   : > { %vm830_vm10 = vcmp.eq.s32.totalorder %v794_v48, %v2147_v30  ;;  %vm831_vm11 = vcmp.eq.s32.totalorder %v794_v48, %v2155_v25  ;;  %805 = vperm.xlu1 %1708, %v2168_v39   ;;  %v579_v39 = vsel %vm547_vm15, 1, %v1811_v9  ;;  %vm545_vm15 = vcmp.eq.s32.totalorder %v2377_v5, %v2155_v25 }
 0x102   : > { %v862_v51 = vsel %vm830_vm10, 1, %v1811_v9  ;;  %v863_v53 = vsel %vm831_vm11, 1, %v1811_v9  ;;  %vm672_vm10 = vcmp.eq.s32.totalorder %v629_v16, %v2147_v30  ;;  %vm673_vm11 = vcmp.eq.s32.totalorder %v629_v16, %v2155_v25 }
 0x103   : > { %v894_v10 = vadd.s32 %v862_v51, %v750_v1  ;;  %v895_v52 = vadd.s32 %v863_v53, %v751_v31  ;;  %v704_v15 = vsel %vm672_vm10, 1, %v1811_v9  ;;  %v705_v28 = vsel %vm673_vm11, 1, %v1811_v9 }
 0x104   : > { %v577_v6 = vsel %vm545_vm15, 1, %v1811_v9  ;;  %v736_v34 = vadd.s32 %v704_v15, %v592_v11  ;;  %v737_v22 = vadd.s32 %v705_v28, %v593_v35 }
 0x105   : > { %1709 = vset.pattern.permute.xlu1 %v1808_v0  ;;  %v2391_v55 = vpop.permute.xlu1 %231  ;;  %v927_v56 = vcvt.s32.f32 %v895_v52  ;;  %v926_v58 = vcvt.s32.f32 %v894_v10  ;;  %v322_v0 = vsel %vm290_vm12, 1, %v1811_v9  ;;  %vm288_vm12 = vcmp.eq.s32.totalorder %v2308_v44, %v2147_v30 }
 0x106   : > { %664 = vperm.xlu1 %1709, %v2067_v3  }
 0x107   : > { %1084 = vmatprep.mubr.f32.mxu1 %v927_v56 }
 0x108   : > { %1085 = vmatmul.mubr.f32.gmra.mrb[4].mxu1 %v926_v58 }
 0x10a   : > { %1710 = vset.pattern.permute.xlu1 %v1812_v12  ;;  %v2395_v59 = vpop.permute.xlu1 %343  ;;  %v323_v12 = vsel %vm291_vm13, 1, %v1811_v9  ;;  %vm289_vm13 = vcmp.eq.s32.totalorder %v2308_v44, %v2155_v25  ;;  %v320_v44 = vsel %vm288_vm12, 1, %v1811_v9  ;;  %vm834_vm12 = vcmp.eq.s32.totalorder %v2139_v26, %v2147_v30 }
 0x10b   : > { %784 = vperm.xlu1 %1710, %v2099_v8   ;;  %v578_v8 = vsel %vm546_vm14, 1, %v1811_v9  ;;  %vm544_vm14 = vcmp.eq.s32.totalorder %v2377_v5, %v2147_v30  ;;  %v321_v38 = vsel %vm289_vm13, 1, %v1811_v9  ;;  %v464_v40 = vadd.s32 %v432_v54, %v320_v44 }
 0x10c   : > { %v576_v45 = vsel %vm544_vm14, 1, %v1811_v9  ;;  %v465_v5 = vadd.s32 %v433_v36, %v321_v38  ;;  %vm835_vm13 = vcmp.eq.s32.totalorder %v2139_v26, %v2155_v25  ;;  %vm386_vm14 = vcmp.eq.s32.totalorder %v2395_v59, %v2147_v30 }
 0x10d   : > { %v608_v43 = vadd.s32 %v576_v45, %v464_v40  ;;  %vm387_vm15 = vcmp.eq.s32.totalorder %v2395_v59, %v2155_v25  ;;  %v866_v11 = vsel %vm834_vm12, 1, %v1811_v9  ;;  %v867_v35 = vsel %vm835_vm13, 1, %v1811_v9 }
 0x10e   : > { %v368_v3 = vpop.permute.xlu1 %367  ;;  %v609_v32 = vadd.s32 %v577_v6, %v465_v5  ;;  %v418_v54 = vsel %vm386_vm14, 1, %v1811_v9  ;;  %v419_v36 = vsel %vm387_vm15, 1, %v1811_v9 }
 0x10f   : > { %vm402_vm4 = vcmp.eq.s32.totalorder %v368_v3, %v2147_v30  ;;  %vm403_vm5 = vcmp.eq.s32.totalorder %v368_v3, %v2155_v25 }
 0x110   : > { %v434_v17 = vsel %vm402_vm4, 1, %v1811_v9  ;;  %v435_v57 = vsel %vm403_vm5, 1, %v1811_v9 }
 0x111   : > { %v466_v46 = vadd.s32 %v434_v17, %v322_v0  ;;  %v467_v60 = vadd.s32 %v435_v57, %v323_v12  ;;  %v308_v57 = vsel %vm276_vm6, 1, %v1811_v9 }
 0x113   : > { %v653_v7 = vpop.permute.xlu1 %652  ;;  %v2430_v2 = vadd.s32 %v578_v8, %v466_v46  ;;  %v2432_v14 = vadd.s32 %v579_v39, %v467_v60  ;;  %v309_v46 = vsel %vm277_vm7, 1, %v1811_v9 }
 0x114   : > { %vm688_vm0 = vcmp.eq.s32.totalorder %v653_v7, %v2147_v30  ;;  %vm689_vm1 = vcmp.eq.s32.totalorder %v653_v7, %v2155_v25 }
 0x115   : > { %v720_v41 = vsel %vm688_vm0, 1, %v1811_v9  ;;  %v721_v42 = vsel %vm689_vm1, 1, %v1811_v9 }
 0x116   : > { %v752_v51 = vadd.s32 %v720_v41, %v608_v43  ;;  %v753_v53 = vadd.s32 %v721_v42, %v609_v32 }
 0x118   : > { %v2446_v33 = vpop.permute.xlu1 %487 }
 0x11d   : > { %v773_v37 = vpop.permute.xlu1 %772 }
 0x11e   : > { %vm816_vm2 = vcmp.eq.s32.totalorder %v773_v37, %v2147_v30  ;;  %vm817_vm3 = vcmp.eq.s32.totalorder %v773_v37, %v2155_v25 }
 0x11f   : > { %v848_v47 = vsel %vm816_vm2, 1, %v1811_v9  ;;  %v849_v48 = vsel %vm817_vm3, 1, %v1811_v9  ;;  %vm274_vm2 = vcmp.eq.s32.totalorder %v2391_v55, %v2147_v30  ;;  %vm275_vm3 = vcmp.eq.s32.totalorder %v2391_v55, %v2155_v25 }
 0x120   : > { %v880_v1 = vadd.s32 %v848_v47, %v736_v34  ;;  %v881_v31 = vadd.s32 %v849_v48, %v737_v22 }
 0x121   : > { %v797_v10 = vpop.permute.xlu1 %796 }
 0x122   : > { %vm832_vm4 = vcmp.eq.s32.totalorder %v797_v10, %v2147_v30  ;;  %vm833_vm5 = vcmp.eq.s32.totalorder %v797_v10, %v2155_v25  ;;  %v913_v52 = vcvt.s32.f32 %v881_v31  ;;  %v912_v56 = vcvt.s32.f32 %v880_v1 }
 0x123   : > { %v864_v58 = vsel %vm832_vm4, 1, %v1811_v9  ;;  %v865_v0 = vsel %vm833_vm5, 1, %v1811_v9  ;;  %vm530_vm4 = vcmp.eq.s32.totalorder %v2446_v33, %v2147_v30  ;;  %vm531_vm5 = vcmp.eq.s32.totalorder %v2446_v33, %v2155_v25 }
 0x124   : > { %v896_v12 = vadd.s32 %v864_v58, %v752_v51  ;;  %v897_v3 = vadd.s32 %v865_v0, %v753_v53  ;;  %1049 = vmatprep.mubr.f32.mxu0 %v913_v52  ;;  %v562_v33 = vsel %vm530_vm4, 1, %v1811_v9  ;;  %v563_v38 = vsel %vm531_vm5, 1, %v1811_v9 }
 0x125   : > { %1050 = vmatmul.mubr.f32.gmra.mrb[6].mxu0 %v912_v56 }
 0x126   : > { %v2472_v8 = vpop.permute.xlu1 %258  ;;  %v929_v39 = vcvt.s32.f32 %v897_v3  ;;  %v928_v17 = vcvt.s32.f32 %v896_v12 }
 0x127   : > { %vm292_vm14 = vcmp.eq.s32.totalorder %v2472_v8, %v2147_v30  ;;  %vm293_vm15 = vcmp.eq.s32.totalorder %v2472_v8, %v2155_v25 }
 0x128   : > { %1089 = vmatprep.mubr.f32.mxu1 %v929_v39 }
 0x129   : > { %1090 = vmatmul.mubr.f32.gmra.mrb[6].mxu1 %v928_v17 }
 0x12b   : > { %v347_v60 = vpop.permute.xlu1 %346 }
 0x12c   : > { %vm388_vm10 = vcmp.eq.s32.totalorder %v347_v60, %v2147_v30  ;;  %vm389_vm11 = vcmp.eq.s32.totalorder %v347_v60, %v2155_v25  ;;  %v325_v60 = vsel %vm293_vm15, 1, %v1811_v9 }
 0x12d   : > { %v420_v61 = vsel %vm388_vm10, 1, %v1811_v9  ;;  %v421_v24 = vsel %vm389_vm11, 1, %v1811_v9  ;;  %vm820_vm10 = vcmp.eq.s32.totalorder %v2145_v29, %v2147_v30  ;;  %vm821_vm11 = vcmp.eq.s32.totalorder %v2145_v29, %v2155_v25 }
 0x12e   : > { %v452_v13 = vadd.s32 %v420_v61, %v308_v57  ;;  %v453_v7 = vadd.s32 %v421_v24, %v309_v46  ;;  %v852_v29 = vsel %vm820_vm10, 1, %v1811_v9  ;;  %v853_v39 = vsel %vm821_vm11, 1, %v1811_v9 }
 0x12f   : > { %v324_v46 = vsel %vm292_vm14, 1, %v1811_v9  ;;  %vm552_vm10 = vcmp.eq.s32.totalorder %v2345_v62, %v2147_v30  ;;  %vm553_vm11 = vcmp.eq.s32.totalorder %v2345_v62, %v2155_v25 }
 0x130   : > { %v632_v50 = vpop.permute.xlu1 %631  ;;  %v2490_v16 = vadd.s32 %v564_v49, %v452_v13  ;;  %v2492_v23 = vadd.s32 %v565_v63, %v453_v7  ;;  %v659_v49 = vpop.permute.xlu0 %658 }
 0x131   : > { %vm674_vm6 = vcmp.eq.s32.totalorder %v632_v50, %v2147_v30  ;;  %vm675_vm7 = vcmp.eq.s32.totalorder %v632_v50, %v2155_v25  ;;  %vm692_vm4 = vcmp.eq.s32.totalorder %v659_v49, %v2147_v30  ;;  %vm693_vm5 = vcmp.eq.s32.totalorder %v659_v49, %v2155_v25 }
 0x132   : > { %v706_v34 = vsel %vm674_vm6, 1, %v1811_v9  ;;  %v707_v22 = vsel %vm675_vm7, 1, %v1811_v9 }
 0x134   : > { %v656_v21 = vpop.permute.xlu1 %655 }
 0x135   : > { %vm690_vm0 = vcmp.eq.s32.totalorder %v656_v21, %v2147_v30  ;;  %vm691_vm1 = vcmp.eq.s32.totalorder %v656_v21, %v2155_v25 }
 0x136   : > { %v722_v4 = vsel %vm690_vm0, 1, %v1811_v9  ;;  %v723_v26 = vsel %vm691_vm1, 1, %v1811_v9  ;;  %vm404_vm0 = vcmp.eq.s32.totalorder %v2119_v18, %v2147_v30  ;;  %vm405_vm1 = vcmp.eq.s32.totalorder %v2119_v18, %v2155_v25 }
 0x137   : > { %v754_v59 = vadd.s32 %v722_v4, %v2430_v2  ;;  %v755_v27 = vadd.s32 %v723_v26, %v2432_v14  ;;  %v306_v2 = vsel %vm274_vm2, 1, %v1811_v9  ;;  %v307_v14 = vsel %vm275_vm3, 1, %v1811_v9 }
 0x138   : > { %v450_v45 = vadd.s32 %v418_v54, %v306_v2  ;;  %v451_v6 = vadd.s32 %v419_v36, %v307_v14  ;;  %v436_v18 = vsel %vm404_vm0, 1, %v1811_v9  ;;  %v437_v24 = vsel %vm405_vm1, 1, %v1811_v9 }
 0x139   : > { %v515_v15 = vpop.permute.xlu1 %514  ;;  %v899_v28 = vadd.s32 %v867_v35, %v755_v27  ;;  %v898_v44 = vadd.s32 %v866_v11, %v754_v59  ;;  %v468_v50 = vadd.s32 %v436_v18, %v324_v46  ;;  %v724_v26 = vsel %vm692_vm4, 1, %v1811_v9 }
 0x13a   : > { %v594_v37 = vadd.s32 %v562_v33, %v450_v45  ;;  %v595_v41 = vadd.s32 %v563_v38, %v451_v6  ;;  %vm548_vm2 = vcmp.eq.s32.totalorder %v515_v15, %v2147_v30  ;;  %vm549_vm3 = vcmp.eq.s32.totalorder %v515_v15, %v2155_v25 }
 0x13b   : > { %v931_v40 = vcvt.s32.f32 %v899_v28  ;;  %v930_v5 = vcvt.s32.f32 %v898_v44  ;;  %v580_v13 = vsel %vm548_vm2, 1, %v1811_v9  ;;  %v581_v7 = vsel %vm549_vm3, 1, %v1811_v9 }
 0x13c   : > { %v738_v43 = vadd.s32 %v706_v34, %v594_v37  ;;  %v739_v55 = vadd.s32 %v707_v22, %v595_v41  ;;  %v612_v21 = vadd.s32 %v580_v13, %v468_v50  ;;  %v725_v59 = vsel %vm693_vm5, 1, %v1811_v9 }
 0x13d   : > { %1094 = vmatprep.mubr.f32.mxu1 %v931_v40  ;;  %vm390_vm0 = vcmp.eq.s32.totalorder %v2125_v20, %v2147_v30  ;;  %vm391_vm1 = vcmp.eq.s32.totalorder %v2125_v20, %v2155_v25  ;;  %v584_v34 = vsel %vm552_vm10, 1, %v1811_v9  ;;  %v585_v22 = vsel %vm553_vm11, 1, %v1811_v9 }
 0x13e   : > { %1095 = vmatmul.mubr.f32.gmra.mrb[8].mxu1 %v930_v5  ;;  %v776_v42 = vpop.permute.xlu1 %775  ;;  %v756_v11 = vadd.s32 %v724_v26, %v612_v21 }
 0x13f   : > { %vm818_vm8 = vcmp.eq.s32.totalorder %v776_v42, %v2147_v30  ;;  %vm819_vm9 = vcmp.eq.s32.totalorder %v776_v42, %v2155_v25  ;;  %v638_v42 = vpop.permute.xlu0 %637 }
 0x140   : > { %v850_v32 = vsel %vm818_vm8, 1, %v1811_v9  ;;  %v851_v47 = vsel %vm819_vm9, 1, %v1811_v9  ;;  %vm296_vm8 = vcmp.eq.s32.totalorder %v2233_v19, %v2147_v30  ;;  %vm297_vm9 = vcmp.eq.s32.totalorder %v2233_v19, %v2155_v25 }
 0x141   : > { %v882_v48 = vadd.s32 %v850_v32, %v738_v43  ;;  %v883_v1 = vadd.s32 %v851_v47, %v739_v55  ;;  %v328_v45 = vsel %vm296_vm8, 1, %v1811_v9  ;;  %v329_v19 = vsel %vm297_vm9, 1, %v1811_v9 }
 0x142   : > { %v422_v32 = vsel %vm390_vm0, 1, %v1811_v9  ;;  %v423_v47 = vsel %vm391_vm1, 1, %v1811_v9 }
 0x143   : > { %v2538_v31 = vpop.permute.xlu1 %237  ;;  %v915_v51 = vcvt.s32.f32 %v883_v1  ;;  %v914_v53 = vcvt.s32.f32 %v882_v48 }
 0x145   : > { %1054 = vmatprep.mubr.f32.mxu0 %v915_v51 }
 0x146   : > { %1055 = vmatmul.mubr.f32.gmra.mrb[8].mxu0 %v914_v53 }
 0x147   : > { %v2540_v10 = vpop.permute.xlu1 %261 }
 0x148   : > { %vm294_vm8 = vcmp.eq.s32.totalorder %v2540_v10, %v2147_v30  ;;  %vm295_vm9 = vcmp.eq.s32.totalorder %v2540_v10, %v2155_v25 }
 0x149   : > { %v327_v10 = vsel %vm295_vm9, 1, %v1811_v9 }
 0x14c   : > { %v2542_v52 = vpop.permute.xlu1 %373 }
 0x14d   : > { %vm406_vm4 = vcmp.eq.s32.totalorder %v2542_v52, %v2147_v30  ;;  %vm407_vm5 = vcmp.eq.s32.totalorder %v2542_v52, %v2155_v25 }
 0x14e   : > { %v438_v53 = vsel %vm406_vm4, 1, %v1811_v9  ;;  %v439_v52 = vsel %vm407_vm5, 1, %v1811_v9 }
 0x151   : > { %v635_v56 = vpop.permute.xlu1 %634 }
 0x152   : > { %vm676_vm12 = vcmp.eq.s32.totalorder %v635_v56, %v2147_v30  ;;  %vm677_vm13 = vcmp.eq.s32.totalorder %v635_v56, %v2155_v25 }
 0x153   : > { %v708_v58 = vsel %vm676_vm12, 1, %v1811_v9  ;;  %v709_v0 = vsel %vm677_vm13, 1, %v1811_v9  ;;  %vm278_vm12 = vcmp.eq.s32.totalorder %v2538_v31, %v2147_v30  ;;  %vm279_vm13 = vcmp.eq.s32.totalorder %v2538_v31, %v2155_v25 }
 0x154   : > { %v740_v12 = vadd.s32 %v708_v58, %v2490_v16  ;;  %v741_v3 = vadd.s32 %v709_v0, %v2492_v23  ;;  %v469_v16 = vadd.s32 %v437_v24, %v325_v60  ;;  %v310_v37 = vsel %vm278_vm12, 1, %v1811_v9 }
 0x155   : > { %v311_v41 = vsel %vm279_vm13, 1, %v1811_v9  ;;  %v454_v48 = vadd.s32 %v422_v32, %v310_v37 }
 0x156   : > { %v2566_v17 = vpop.permute.xlu1 %493  ;;  %v885_v8 = vadd.s32 %v853_v39, %v741_v3  ;;  %v884_v57 = vadd.s32 %v852_v29, %v740_v12  ;;  %v613_v4 = vadd.s32 %v581_v7, %v469_v16  ;;  %v455_v1 = vadd.s32 %v423_v47, %v311_v41 }
 0x157   : > { %vm534_vm2 = vcmp.eq.s32.totalorder %v2566_v17, %v2147_v30  ;;  %vm535_vm3 = vcmp.eq.s32.totalorder %v2566_v17, %v2155_v25  ;;  %v326_v29 = vsel %vm294_vm8, 1, %v1811_v9 }
 0x158   : > { %v917_v63 = vcvt.s32.f32 %v885_v8  ;;  %v916_v61 = vcvt.s32.f32 %v884_v57  ;;  %v757_v35 = vadd.s32 %v725_v59, %v613_v4  ;;  %v566_v31 = vsel %vm534_vm2, 1, %v1811_v9 }
 0x159   : > { %v567_v51 = vsel %vm535_vm3, 1, %v1811_v9  ;;  %v598_v58 = vadd.s32 %v566_v31, %v454_v48  ;;  %v470_v8 = vadd.s32 %v438_v53, %v326_v29  ;;  %v471_v57 = vadd.s32 %v439_v52, %v327_v10 }
 0x15a   : > { %1059 = vmatprep.mubr.f32.mxu0 %v917_v63  ;;  %v2576_v23 = vpop.permute.xlu1 %517  ;;  %v599_v0 = vadd.s32 %v567_v51, %v455_v1 }
 0x15b   : > { %1060 = vmatmul.mubr.f32.gmra.mrb[10].mxu0 %v916_v61  ;;  %vm550_vm10 = vcmp.eq.s32.totalorder %v2576_v23, %v2147_v30  ;;  %vm551_vm11 = vcmp.eq.s32.totalorder %v2576_v23, %v2155_v25  ;;  %v641_v61 = vpop.permute.xlu0 %640 }
 0x15c   : > { %v582_v39 = vsel %vm550_vm10, 1, %v1811_v9  ;;  %v583_v17 = vsel %vm551_vm11, 1, %v1811_v9  ;;  %vm680_vm2 = vcmp.eq.s32.totalorder %v641_v61, %v2147_v30  ;;  %vm681_vm3 = vcmp.eq.s32.totalorder %v641_v61, %v2155_v25 }
 0x15d   : > { %v614_v49 = vadd.s32 %v582_v39, %v470_v8  ;;  %v615_v63 = vadd.s32 %v583_v17, %v471_v57  ;;  %v712_v47 = vsel %vm680_vm2, 1, %v1811_v9  ;;  %v713_v48 = vsel %vm681_vm3, 1, %v1811_v9 }
 0x15f   : > { %v803_v27 = vpop.permute.xlu1 %802  ;;  %v809_v59 = vpop.permute.xlu0 %808 }
 0x160   : > { %vm836_vm6 = vcmp.eq.s32.totalorder %v803_v27, %v2147_v30  ;;  %vm837_vm7 = vcmp.eq.s32.totalorder %v803_v27, %v2155_v25  ;;  %vm840_vm10 = vcmp.eq.s32.totalorder %v809_v59, %v2147_v30  ;;  %vm841_vm11 = vcmp.eq.s32.totalorder %v809_v59, %v2155_v25 }
 0x161   : > { %v868_v54 = vsel %vm836_vm6, 1, %v1811_v9  ;;  %v869_v36 = vsel %vm837_vm7, 1, %v1811_v9  ;;  %vm678_vm6 = vcmp.eq.s32.totalorder %v638_v42, %v2147_v30  ;;  %vm679_vm7 = vcmp.eq.s32.totalorder %v638_v42, %v2155_v25 }
 0x162   : > { %v900_v15 = vadd.s32 %v868_v54, %v756_v11  ;;  %v901_v28 = vadd.s32 %v869_v36, %v757_v35  ;;  %v710_v12 = vsel %vm678_vm6, 1, %v1811_v9  ;;  %v711_v3 = vsel %vm679_vm7, 1, %v1811_v9 }
 0x163   : > { %v742_v46 = vadd.s32 %v710_v12, %v598_v58  ;;  %v743_v60 = vadd.s32 %v711_v3, %v599_v0 }
 0x164   : > { %v2584_v44 = vpop.permute.xlu1 %240  ;;  %v933_v2 = vcvt.s32.f32 %v901_v28  ;;  %v932_v14 = vcvt.s32.f32 %v900_v15 }
 0x165   : > { %vm280_vm0 = vcmp.eq.s32.totalorder %v2584_v44, %v2147_v30  ;;  %vm281_vm1 = vcmp.eq.s32.totalorder %v2584_v44, %v2155_v25  ;;  %v872_v44 = vsel %vm840_vm10, 1, %v1811_v9 }
 0x166   : > { %1099 = vmatprep.mubr.f32.mxu1 %v933_v2 }
 0x167   : > { %1100 = vmatmul.mubr.f32.gmra.mrb[10].mxu1 %v932_v14  ;;  %v312_v14 = vsel %vm280_vm0, 1, %v1811_v9 }
 0x169   : > { %v2586_v33 = vpop.permute.xlu1 %352 }
 0x16a   : > { %vm392_vm4 = vcmp.eq.s32.totalorder %v2586_v33, %v2147_v30  ;;  %vm393_vm5 = vcmp.eq.s32.totalorder %v2586_v33, %v2155_v25  ;;  %v313_v33 = vsel %vm281_vm1, 1, %v1811_v9 }
 0x16b   : > { %v424_v35 = vsel %vm392_vm4, 1, %v1811_v9  ;;  %v425_v54 = vsel %vm393_vm5, 1, %v1811_v9 }
 0x16d   : > { %v377_v38 = vpop.permute.xlu1 %376 }
 0x16e   : > { %vm408_vm14 = vcmp.eq.s32.totalorder %v377_v38, %v2147_v30  ;;  %vm409_vm15 = vcmp.eq.s32.totalorder %v377_v38, %v2155_v25 }
 0x16f   : > { %v440_v6 = vsel %vm408_vm14, 1, %v1811_v9  ;;  %v441_v40 = vsel %vm409_vm15, 1, %v1811_v9 }
 0x170   : > { %v472_v62 = vadd.s32 %v440_v6, %v328_v45  ;;  %v473_v5 = vadd.s32 %v441_v40, %v329_v19  ;;  %v456_v19 = vadd.s32 %v424_v35, %v312_v14  ;;  %v457_v6 = vadd.s32 %v425_v54, %v313_v33 }
 0x172   : > { %v662_v43 = vpop.permute.xlu1 %661  ;;  %v2618_v55 = vadd.s32 %v584_v34, %v472_v62  ;;  %v2620_v20 = vadd.s32 %v585_v22, %v473_v5  ;;  %v873_v34 = vsel %vm841_vm11, 1, %v1811_v9 }
 0x173   : > { %vm694_vm12 = vcmp.eq.s32.totalorder %v662_v43, %v2147_v30  ;;  %vm695_vm13 = vcmp.eq.s32.totalorder %v662_v43, %v2155_v25 }
 0x174   : > { %v726_v24 = vsel %vm694_vm12, 1, %v1811_v9  ;;  %v727_v13 = vsel %vm695_vm13, 1, %v1811_v9 }
 0x175   : > { %v758_v21 = vadd.s32 %v726_v24, %v614_v49  ;;  %v759_v4 = vadd.s32 %v727_v13, %v615_v63 }
 0x177   : > { %v497_v56 = vpop.permute.xlu1 %496 }
 0x178   : > { %vm536_vm6 = vcmp.eq.s32.totalorder %v497_v56, %v2147_v30  ;;  %vm537_vm7 = vcmp.eq.s32.totalorder %v497_v56, %v2155_v25 }
 0x179   : > { %v568_v38 = vsel %vm536_vm6, 1, %v1811_v9  ;;  %v569_v45 = vsel %vm537_vm7, 1, %v1811_v9 }
 0x17a   : > { %v600_v22 = vadd.s32 %v568_v38, %v456_v19  ;;  %v601_v37 = vadd.s32 %v569_v45, %v457_v6 }
 0x17c   : > { %v782_v18 = vpop.permute.xlu1 %781  ;;  %v744_v53 = vadd.s32 %v712_v47, %v600_v22  ;;  %v745_v52 = vadd.s32 %v713_v48, %v601_v37 }
 0x17d   : > { %vm822_vm14 = vcmp.eq.s32.totalorder %v782_v18, %v2147_v30  ;;  %vm823_vm15 = vcmp.eq.s32.totalorder %v782_v18, %v2155_v25 }
 0x17e   : > { %v854_v7 = vsel %vm822_vm14, 1, %v1811_v9  ;;  %v855_v50 = vsel %vm823_vm15, 1, %v1811_v9 }
 0x17f   : > { %v886_v16 = vadd.s32 %v854_v7, %v742_v46  ;;  %v887_v23 = vadd.s32 %v855_v50, %v743_v60 }
 0x180   : > { %v806_v26 = vpop.permute.xlu1 %805 }
 0x181   : > { %vm838_vm8 = vcmp.eq.s32.totalorder %v806_v26, %v2147_v30  ;;  %vm839_vm9 = vcmp.eq.s32.totalorder %v806_v26, %v2155_v25  ;;  %v919_v27 = vcvt.s32.f32 %v887_v23  ;;  %v918_v11 = vcvt.s32.f32 %v886_v16 }
 0x182   : > { %v870_v36 = vsel %vm838_vm8, 1, %v1811_v9  ;;  %v871_v15 = vsel %vm839_vm9, 1, %v1811_v9 }
 0x183   : > { %v902_v28 = vadd.s32 %v870_v36, %v758_v21  ;;  %v903_v2 = vadd.s32 %v871_v15, %v759_v4  ;;  %1064 = vmatprep.mubr.f32.mxu0 %v919_v27 }
 0x184   : > { %1065 = vmatmul.mubr.f32.gmra.mrb[12].mxu0 %v918_v11 }
 0x185   : > { %v665_v40 = vpop.permute.xlu1 %664  ;;  %v935_v62 = vcvt.s32.f32 %v903_v2  ;;  %v934_v5 = vcvt.s32.f32 %v902_v28 }
 0x186   : > { %vm696_vm12 = vcmp.eq.s32.totalorder %v665_v40, %v2147_v30  ;;  %vm697_vm13 = vcmp.eq.s32.totalorder %v665_v40, %v2155_v25 }
 0x187   : > { %v728_v41 = vsel %vm696_vm12, 1, %v1811_v9  ;;  %v729_v42 = vsel %vm697_vm13, 1, %v1811_v9  ;;  %1104 = vmatprep.mubr.f32.mxu1 %v935_v62 }
 0x188   : > { %v760_v43 = vadd.s32 %v728_v41, %v2618_v55  ;;  %v761_v32 = vadd.s32 %v729_v42, %v2620_v20  ;;  %1105 = vmatmul.mubr.f32.gmra.mrb[12].mxu1 %v934_v5 }
 0x18a   : > { %v904_v1 = vadd.s32 %v872_v44, %v760_v43  ;;  %v905_v31 = vadd.s32 %v873_v34, %v761_v32  ;;  %v785_v51 = vpop.permute.xlu1 %784 }
 0x18b   : > { %vm824_vm14 = vcmp.eq.s32.totalorder %v785_v51, %v2147_v30  ;;  %vm825_vm15 = vcmp.eq.s32.totalorder %v785_v51, %v2155_v25 }
 0x18c   : > { %v856_v55 = vsel %vm824_vm14, 1, %v1811_v9  ;;  %v857_v20 = vsel %vm825_vm15, 1, %v1811_v9  ;;  %v937_v56 = vcvt.s32.f32 %v905_v31  ;;  %v936_v58 = vcvt.s32.f32 %v904_v1 }
 0x18d   : > { %v888_v0 = vadd.s32 %v856_v55, %v744_v53  ;;  %v889_v12 = vadd.s32 %v857_v20, %v745_v52 }
 0x18e   : > { %1109 = vmatprep.mubr.f32.mxu1 %v937_v56 }
 0x18f   : > { %1110 = vmatmul.mubr.f32.gmra.mrb[14].mxu1 %v936_v58  ;;  %v921_v3 = vcvt.s32.f32 %v889_v12  ;;  %v920_v29 = vcvt.s32.f32 %v888_v0 }
 0x191   : > { %1069 = vmatprep.mubr.f32.mxu0 %v921_v3 }
 0x192   : > { %1070 = vmatmul.mubr.f32.gmra.mrb[14].mxu0 %v920_v29 }
 0x1a4   : > { %v1548_v10 = vpop.f32.mrb[0].mxu1 }
 0x1a5   : > { %v1549_v39 = vpop.f32.mrb[1].mxu1 }
 0x1a6   : > { %v2708_v17 = vadd.f32 %v1549_v39, %v1548_v10 }
 0x1a8   : > { %v1155_v18 = vmul.f32 %v2708_v17, %v2708_v17 }
 0x1bb   : > { %v1524_v30 = vpop.f32.mrb[0].mxu0 }
 0x1bc   : > { %v1525_v25 = vpop.f32.mrb[1].mxu0 }
 0x1bd   : > { %v2710_v8 = vadd.f32 %v1525_v25, %v1524_v30 }
 0x1bf   : > { %1115 = vadd.xlane.f32.xlu1 %v2710_v8  ;;  %v1527_v9 = vpop.f32.mrb[2].mxu0  ;;  %v1147_v61 = vmul.f32 %v2710_v8, %v2710_v8 }
 0x1c0   : > { %v1551_v57 = vpop.f32.mrb[2].mxu1  ;;  %v1528_v46 = vpop.f32.mrb[3].mxu0 }
 0x1c1   : > { %v2713_v60 = vadd.f32 %v1528_v46, %v1527_v9  ;;  %v1552_v49 = vpop.f32.mrb[3].mxu1 }
 0x1c2   : > { %v2715_v63 = vadd.f32 %v1552_v49, %v1551_v57 }
 0x1c3   : > { %1131 = vadd.xlane.f32.xlu1 %v2708_v17  ;;  %1117 = vadd.xlane.f32.xlu0 %v2713_v60  ;;  %v1148_v24 = vmul.f32 %v2713_v60, %v2713_v60 }
 0x1c4   : > { %v1156_v13 = vmul.f32 %v2715_v63, %v2715_v63 }
 0x1c7   : > { %1163 = vadd.xlane.f32.xlu1 %v1147_v61  ;;  %1133 = vadd.xlane.f32.xlu0 %v2715_v63 }
 0x1cb   : > { %1179 = vadd.xlane.f32.xlu1 %v1155_v18  ;;  %1165 = vadd.xlane.f32.xlu0 %v1148_v24 }
 0x1cf   : > { %v1530_v7 = vpop.f32.mrb[4].mxu0  ;;  %1181 = vadd.xlane.f32.xlu0 %v1156_v13 }
 0x1d0   : > { %v1531_v50 = vpop.f32.mrb[5].mxu0 }
 0x1d1   : > { %v2728_v16 = vadd.f32 %v1531_v50, %v1530_v7 }
 0x1d3   : > { %1119 = vadd.xlane.f32.xlu1 %v2728_v16  ;;  %v1149_v26 = vmul.f32 %v2728_v16, %v2728_v16 }
 0x1db   : > { %v1554_v23 = vpop.f32.mrb[4].mxu1 }
 0x1dc   : > { %v1555_v21 = vpop.f32.mrb[5].mxu1 }
 0x1dd   : > { %v2731_v4 = vadd.f32 %v1555_v21, %v1554_v23 }
 0x1df   : > { %1135 = vadd.xlane.f32.xlu1 %v2731_v4  ;;  %v1157_v59 = vmul.f32 %v2731_v4, %v2731_v4 }
 0x1e3   : > { %1167 = vadd.xlane.f32.xlu1 %v1149_v26 }
 0x1e7   : > { %1183 = vadd.xlane.f32.xlu1 %v1157_v59 }
 0x1f8   : > { %v1533_v27 = vpop.f32.mrb[6].mxu0 }
 0x1f9   : > { %v1534_v11 = vpop.f32.mrb[7].mxu0 }
 0x1fa   : > { %v2738_v35 = vadd.f32 %v1534_v11, %v1533_v27 }
 0x1fc   : > { %1121 = vadd.xlane.f32.xlu0 %v2738_v35  ;;  %v1557_v54 = vpop.f32.mrb[6].mxu1  ;;  %v1150_v28 = vmul.f32 %v2738_v35, %v2738_v35 }
 0x1fd   : > { %v1558_v36 = vpop.f32.mrb[7].mxu1 }
 0x1fe   : > { %v2741_v15 = vadd.f32 %v1558_v36, %v1557_v54 }
 0x200   : > { %1137 = vadd.xlane.f32.xlu0 %v2741_v15  ;;  %v1158_v2 = vmul.f32 %v2741_v15, %v2741_v15 }
 0x204   : > { %1169 = vadd.xlane.f32.xlu0 %v1150_v28 }
 0x208   : > { %1185 = vadd.xlane.f32.xlu0 %v1158_v2 }
 0x211   : > { %v1560_v14 = vpop.f32.mrb[8].mxu1 }
 0x212   : > { %v1561_v33 = vpop.f32.mrb[9].mxu1 }
 0x213   : > { %v2748_v38 = vadd.f32 %v1561_v33, %v1560_v14 }
 0x215   : > { %v1159_v62 = vmul.f32 %v2748_v38, %v2748_v38 }
 0x219   : > { %v1536_v45 = vpop.f32.mrb[8].mxu0 }
 0x21a   : > { %v1537_v19 = vpop.f32.mrb[9].mxu0 }
 0x21b   : > { %v2750_v6 = vadd.f32 %v1537_v19, %v1536_v45 }
 0x21d   : > { %1123 = vadd.xlane.f32.xlu1 %v2750_v6  ;;  %v1151_v40 = vmul.f32 %v2750_v6, %v2750_v6 }
 0x221   : > { %1139 = vadd.xlane.f32.xlu1 %v2748_v38 }
 0x225   : > { %1171 = vadd.xlane.f32.xlu1 %v1151_v40 }
 0x229   : > { %1187 = vadd.xlane.f32.xlu1 %v1159_v62 }
 0x22e   : > { %v1539_v5 = vpop.f32.mrb[10].mxu0 }
 0x22f   : > { %v1540_v44 = vpop.f32.mrb[11].mxu0 }
 0x230   : > { %v2758_v34 = vadd.f32 %v1540_v44, %v1539_v5 }
 0x232   : > { %1125 = vadd.xlane.f32.xlu0 %v2758_v34  ;;  %v1152_v42 = vmul.f32 %v2758_v34, %v2758_v34 }
 0x23a   : > { %v1563_v22 = vpop.f32.mrb[10].mxu1 }
 0x23b   : > { %v1564_v37 = vpop.f32.mrb[11].mxu1 }
 0x23c   : > { %v2761_v41 = vadd.f32 %v1564_v37, %v1563_v22  ;;  %v2800_v37 = vld [vmem:[%s2936_s2] ss:$0 sm:$0xff] }
 0x23e   : > { %1141 = vadd.xlane.f32.xlu0 %v2761_v41  ;;  %v1160_v43 = vmul.f32 %v2761_v41, %v2761_v41 }
 0x242   : > { %1173 = vadd.xlane.f32.xlu0 %v1152_v42 }
 0x246   : > { %1189 = vadd.xlane.f32.xlu0 %v1160_v43  ;;  %v2807_v43 = vld [vmem:[%s2937_s3] ss:$0 sm:$0xff] }
 0x24c   : > { %v1116_v32 = vpop.xlane.xlu1 %1115 }
 0x24d   : > { %v1195_v1 = vmul.f32 0.0078125, %v1116_v32 }
 0x24f   : > { %v1227_v52 = vmul.f32 %v1195_v1, %v1195_v1  ;;  %v1307_v44 = vsub.f32 %v2710_v8, %v1195_v1 }
 0x250   : > { %v1118_v47 = vpop.xlane.xlu0 %1117  ;;  %v1132_v48 = vpop.xlane.xlu1 %1131 }
 0x251   : > { %v2768_v31 = vmul.f32 0.0078125, %v1118_v47  ;;  %v2770_v55 = vmul.f32 0.0078125, %v1132_v48 }
 0x253   : > { %v1228_v3 = vmul.f32 %v2768_v31, %v2768_v31  ;;  %v1235_v30 = vmul.f32 %v2770_v55, %v2770_v55  ;;  %v1308_v8 = vsub.f32 %v2713_v60, %v2768_v31 }
 0x254   : > { %v1134_v51 = vpop.xlane.xlu0 %1133  ;;  %v1164_v53 = vpop.xlane.xlu1 %1163 }
 0x255   : > { %v1211_v20 = vmul.f32 0.0078125, %v1164_v53  ;;  %v2776_v29 = vmul.f32 0.0078125, %v1134_v51  ;;  %v1315_v51 = vsub.f32 %v2708_v17, %v2770_v55 }
 0x257   : > { %v1542_v56 = vpop.f32.mrb[12].mxu0  ;;  %v1243_v0 = vsub.f32 %v1211_v20, %v1227_v52  ;;  %v1236_v7 = vmul.f32 %v2776_v29, %v2776_v29 }
 0x258   : > { %v1543_v58 = vpop.f32.mrb[13].mxu0  ;;  %v1166_v10 = vpop.xlane.xlu0 %1165 }
 0x259   : > { %v2772_v12 = vadd.f32 %v1543_v58, %v1542_v56  ;;  %v1180_v39 = vpop.xlane.xlu1 %1179  ;;  %v1259_v25 = vmax.f32 %v1243_v0, 0.0  ;;  %v1212_v9 = vmul.f32 0.0078125, %v1166_v10  ;;  %v1316_v58 = vsub.f32 %v2715_v63, %v2776_v29 }
 0x25a   : > { %v1219_v57 = vmul.f32 0.0078125, %v1180_v39 }
 0x25b   : > { %1127 = vadd.xlane.f32.xlu1 %v2772_v12  ;;  %v1566_v46 = vpop.f32.mrb[12].mxu1  ;;  %v1275_v61 = vadd.f32 1e-12, %v1259_v25  ;;  %v1244_v18 = vsub.f32 %v1212_v9, %v1228_v3  ;;  %v1153_v36 = vmul.f32 %v2772_v12, %v2772_v12 }
 0x25c   : > { %v1567_v49 = vpop.f32.mrb[13].mxu1  ;;  %v1251_v24 = vsub.f32 %v1219_v57, %v1235_v30  ;;  %v1182_v50 = vpop.xlane.xlu0 %1181 }
 0x25d   : > { %v2781_v13 = vadd.f32 %v1567_v49, %v1566_v46  ;;  %1712 = vrsqrt.f32 %v1275_v61  ;;  %v1260_v23 = vmax.f32 %v1244_v18, 0.0  ;;  %v1220_v26 = vmul.f32 0.0078125, %v1182_v50 }
 0x25e   : > { %v1267_v21 = vmax.f32 %v1251_v24, 0.0 }
 0x25f   : > { %1143 = vadd.xlane.f32.xlu1 %v2781_v13  ;;  %v1276_v59 = vadd.f32 1e-12, %v1260_v23  ;;  %v1252_v11 = vsub.f32 %v1220_v26, %v1236_v7  ;;  %v1161_v40 = vmul.f32 %v2781_v13, %v2781_v13 }
 0x260   : > { %v1283_v27 = vadd.f32 1e-12, %v1267_v21  ;;  %v1120_v5 = vpop.xlane.xlu1 %1119 }
 0x261   : > { %1714 = vrsqrt.f32 %v1276_v59  ;;  %v1268_v2 = vmax.f32 %v1252_v11, 0.0  ;;  %v1197_v48 = vmul.f32 0.0078125, %v1120_v5 }
 0x262   : > { %v1569_v54 = vpop.f32.mrb[14].mxu1  ;;  %1716 = vrsqrt.f32 %v1283_v27 }
 0x263   : > { %v1570_v28 = vpop.f32.mrb[15].mxu1  ;;  %1175 = vadd.xlane.f32.xlu1 %v1153_v36  ;;  %v1284_v45 = vadd.f32 1e-12, %v1268_v2  ;;  %v1229_v17 = vmul.f32 %v1197_v48, %v1197_v48  ;;  %v1309_v26 = vsub.f32 %v2728_v16, %v1197_v48 }
 0x264   : > { %v2788_v14 = vadd.f32 %v1570_v28, %v1569_v54 }
 0x265   : > { %v1545_v33 = vpop.f32.mrb[14].mxu0  ;;  %1718 = vrsqrt.f32 %v1284_v45 }
 0x266   : > { %v1546_v19 = vpop.f32.mrb[15].mxu0  ;;  %v1162_v25 = vmul.f32 %v2788_v14, %v2788_v14 }
 0x267   : > { %v2792_v62 = vadd.f32 %v1546_v19, %v1545_v33  ;;  %1191 = vadd.xlane.f32.xlu1 %v1161_v40  ;;  %v1713_v22 = vpop.eup %1712 }
 0x268   : > { %v1323_v42 = vmul.f32 %v1713_v22, %v1307_v44 }
 0x269   : > { %1129 = vadd.xlane.f32.xlu0 %v2792_v62  ;;  %v1154_v56 = vmul.f32 %v2792_v62, %v2792_v62 }
 0x26a   : > { %v1346_v47 = vmul.f32 %v2800_v37, %v1323_v42 }
 0x26b   : > { %v1715_v1 = vpop.eup %1714 }
 0x26c   : > { %v1136_v32 = vpop.xlane.xlu1 %1135  ;;  %v1717_v53 = vpop.eup %1716  ;;  %v1369_v52 = vadd.f32 %v2807_v43, %v1346_v47  ;;  %v1324_v20 = vmul.f32 %v1715_v1, %v1308_v8 }
 0x26d   : > { %1145 = vadd.xlane.f32.xlu0 %v2788_v14  ;;  %v1331_v60 = vmul.f32 %v1717_v53, %v1315_v51  ;;  %v1205_v55 = vmul.f32 0.0078125, %v1136_v32 }
 0x26e   : > { %1385 = vst [vmem:[%s2820_s11] sm:$0xff] %v1369_v52  ;;  %v1347_v0 = vmul.f32 %v2800_v37, %v1324_v20 }
 0x26f   : > { %v1719_v10 = vpop.eup %1718  ;;  %v1354_v39 = vmul.f32 %v2800_v37, %v1331_v60  ;;  %v1237_v49 = vmul.f32 %v1205_v55, %v1205_v55  ;;  %v1317_v11 = vsub.f32 %v2731_v4, %v1205_v55 }
 0x270   : > { %v1168_v31 = vpop.xlane.xlu1 %1167  ;;  %v1370_v30 = vadd.f32 %v2807_v43, %v1347_v0  ;;  %v1332_v63 = vmul.f32 %v1719_v10, %v1316_v58 }
 0x271   : > { %v1213_v3 = vmul.f32 0.0078125, %v1168_v31  ;;  %1177 = vadd.xlane.f32.xlu0 %v1154_v56  ;;  %v1377_v9 = vadd.f32 %v2807_v43, %v1354_v39 }
 0x272   : > { %1386 = vst [vmem:[%s2820_s11 + $0x8] sm:$0xff] %v1370_v30  ;;  %v1355_v46 = vmul.f32 %v2800_v37, %v1332_v63 }
 0x273   : > { %v1245_v29 = vsub.f32 %v1213_v3, %v1229_v17  ;;  %1393 = vst [vmem:[%s2820_s11 + $0x40] sm:$0xff] %v1377_v9 }
 0x274   : > { %v1184_v57 = vpop.xlane.xlu1 %1183  ;;  %v1378_v24 = vadd.f32 %v2807_v43, %v1355_v46 }
 0x275   : > { %v1261_v61 = vmax.f32 %v1245_v29, 0.0  ;;  %v1221_v18 = vmul.f32 0.0078125, %v1184_v57  ;;  %1193 = vadd.xlane.f32.xlu0 %v1162_v25 }
 0x276   : > { %1394 = vst [vmem:[%s2820_s11 + $0x48] sm:$0xff] %v1378_v24 }
 0x277   : > { %v1277_v7 = vadd.f32 1e-12, %v1261_v61  ;;  %v1253_v50 = vsub.f32 %v1221_v18, %v1237_v49 }
 0x279   : > { %1720 = vrsqrt.f32 %v1277_v7  ;;  %v1269_v23 = vmax.f32 %v1253_v50, 0.0 }
 0x27b   : > { %v1285_v21 = vadd.f32 1e-12, %v1269_v23 }
 0x27d   : > { %1722 = vrsqrt.f32 %v1285_v21 }
 0x283   : > { %v1721_v59 = vpop.eup %1720 }
 0x284   : > { %v1325_v27 = vmul.f32 %v1721_v59, %v1309_v26 }
 0x286   : > { %v1348_v54 = vmul.f32 %v2800_v37, %v1325_v27 }
 0x287   : > { %v1723_v36 = vpop.eup %1722 }
 0x288   : > { %v1371_v28 = vadd.f32 %v2807_v43, %v1348_v54  ;;  %v1333_v2 = vmul.f32 %v1723_v36, %v1317_v11 }
 0x289   : > { %v1122_v33 = vpop.xlane.xlu0 %1121 }
 0x28a   : > { %1387 = vst [vmem:[%s2820_s11 + $0x10] sm:$0xff] %v1371_v28  ;;  %v1356_v45 = vmul.f32 %v2800_v37, %v1333_v2  ;;  %v1198_v5 = vmul.f32 0.0078125, %v1122_v33 }
 0x28c   : > { %v1379_v19 = vadd.f32 %v2807_v43, %v1356_v45  ;;  %v1230_v44 = vmul.f32 %v1198_v5, %v1198_v5  ;;  %v1310_v20 = vsub.f32 %v2738_v35, %v1198_v5 }
 0x28d   : > { %v1138_v40 = vpop.xlane.xlu0 %1137 }
 0x28e   : > { %1395 = vst [vmem:[%s2820_s11 + $0x50] sm:$0xff] %v1379_v19  ;;  %v1206_v22 = vmul.f32 0.0078125, %v1138_v40 }
 0x290   : > { %v1238_v8 = vmul.f32 %v1206_v22, %v1206_v22  ;;  %v1318_v60 = vsub.f32 %v2741_v15, %v1206_v22 }
 0x291   : > { %v1170_v16 = vpop.xlane.xlu0 %1169 }
 0x292   : > { %v1214_v42 = vmul.f32 0.0078125, %v1170_v16 }
 0x294   : > { %v1246_v4 = vsub.f32 %v1214_v42, %v1230_v44 }
 0x295   : > { %v1186_v32 = vpop.xlane.xlu0 %1185 }
 0x296   : > { %v1262_v47 = vmax.f32 %v1246_v4, 0.0  ;;  %v1222_v48 = vmul.f32 0.0078125, %v1186_v32 }
 0x298   : > { %v1278_v1 = vadd.f32 1e-12, %v1262_v47  ;;  %v1254_v51 = vsub.f32 %v1222_v48, %v1238_v8 }
 0x29a   : > { %1724 = vrsqrt.f32 %v1278_v1  ;;  %v1270_v53 = vmax.f32 %v1254_v51, 0.0 }
 0x29c   : > { %v1286_v52 = vadd.f32 1e-12, %v1270_v53 }
 0x29e   : > { %1726 = vrsqrt.f32 %v1286_v52 }
 0x2a4   : > { %v1725_v56 = vpop.eup %1724 }
 0x2a5   : > { %v1326_v58 = vmul.f32 %v1725_v56, %v1310_v20 }
 0x2a7   : > { %v1349_v31 = vmul.f32 %v2800_v37, %v1326_v58 }
 0x2a8   : > { %v1727_v0 = vpop.eup %1726 }
 0x2a9   : > { %v1372_v17 = vadd.f32 %v2807_v43, %v1349_v31  ;;  %v1334_v55 = vmul.f32 %v1727_v0, %v1318_v60 }
 0x2aa   : > { %v1124_v3 = vpop.xlane.xlu1 %1123 }
 0x2ab   : > { %1388 = vst [vmem:[%s2820_s11 + $0x18] sm:$0xff] %v1372_v17  ;;  %v1357_v10 = vmul.f32 %v2800_v37, %v1334_v55  ;;  %v1199_v63 = vmul.f32 0.0078125, %v1124_v3 }
 0x2ad   : > { %v1380_v39 = vadd.f32 %v2807_v43, %v1357_v10  ;;  %v1231_v29 = vmul.f32 %v1199_v63, %v1199_v63  ;;  %v1311_v23 = vsub.f32 %v2750_v6, %v1199_v63 }
 0x2ae   : > { %v1140_v30 = vpop.xlane.xlu1 %1139 }
 0x2af   : > { %1396 = vst [vmem:[%s2820_s11 + $0x58] sm:$0xff] %v1380_v39  ;;  %v1207_v25 = vmul.f32 0.0078125, %v1140_v30 }
 0x2b1   : > { %v1239_v46 = vmul.f32 %v1207_v25, %v1207_v25  ;;  %v1319_v27 = vsub.f32 %v2748_v38, %v1207_v25 }
 0x2b2   : > { %v1172_v35 = vpop.xlane.xlu1 %1171 }
 0x2b3   : > { %v1215_v9 = vmul.f32 0.0078125, %v1172_v35 }
 0x2b5   : > { %v1247_v15 = vsub.f32 %v1215_v9, %v1231_v29 }
 0x2b6   : > { %v1188_v57 = vpop.xlane.xlu1 %1187 }
 0x2b7   : > { %v1263_v49 = vmax.f32 %v1247_v15, 0.0  ;;  %v1223_v61 = vmul.f32 0.0078125, %v1188_v57 }
 0x2b9   : > { %v1279_v18 = vadd.f32 1e-12, %v1263_v49  ;;  %v1255_v24 = vsub.f32 %v1223_v61, %v1239_v46 }
 0x2bb   : > { %1728 = vrsqrt.f32 %v1279_v18  ;;  %v1271_v7 = vmax.f32 %v1255_v24, 0.0 }
 0x2bd   : > { %v1287_v50 = vadd.f32 1e-12, %v1271_v7 }
 0x2bf   : > { %1730 = vrsqrt.f32 %v1287_v50  ;;  %v1126_v59 = vpop.xlane.xlu0 %1125 }
 0x2c0   : > { %v1200_v45 = vmul.f32 0.0078125, %v1126_v59 }
 0x2c2   : > { %v1232_v6 = vmul.f32 %v1200_v45, %v1200_v45  ;;  %v1312_v1 = vsub.f32 %v2758_v34, %v1200_v45 }
 0x2c5   : > { %v1729_v21 = vpop.eup %1728 }
 0x2c6   : > { %v1327_v26 = vmul.f32 %v1729_v21, %v1311_v23 }
 0x2c8   : > { %v1350_v11 = vmul.f32 %v2800_v37, %v1327_v26 }
 0x2c9   : > { %v1731_v54 = vpop.eup %1730 }
 0x2ca   : > { %v1373_v36 = vadd.f32 %v2807_v43, %v1350_v11  ;;  %v1335_v28 = vmul.f32 %v1731_v54, %v1319_v27 }
 0x2cb   : > { %v1142_v2 = vpop.xlane.xlu0 %1141 }
 0x2cc   : > { %1389 = vst [vmem:[%s2820_s11 + $0x20] sm:$0xff] %v1373_v36  ;;  %v1358_v33 = vmul.f32 %v2800_v37, %v1335_v28  ;;  %v1208_v5 = vmul.f32 0.0078125, %v1142_v2 }
 0x2ce   : > { %v1381_v19 = vadd.f32 %v2807_v43, %v1358_v33  ;;  %v1240_v22 = vmul.f32 %v1208_v5, %v1208_v5  ;;  %v1320_v52 = vsub.f32 %v2761_v41, %v1208_v5 }
 0x2cf   : > { %v1174_v40 = vpop.xlane.xlu0 %1173 }
 0x2d0   : > { %1397 = vst [vmem:[%s2820_s11 + $0x60] sm:$0xff] %v1381_v19  ;;  %v1216_v16 = vmul.f32 0.0078125, %v1174_v40 }
 0x2d2   : > { %v1248_v44 = vsub.f32 %v1216_v16, %v1232_v6 }
 0x2d3   : > { %v1190_v38 = vpop.xlane.xlu0 %1189 }
 0x2d4   : > { %v1264_v42 = vmax.f32 %v1248_v44, 0.0  ;;  %v1224_v4 = vmul.f32 0.0078125, %v1190_v38 }
 0x2d6   : > { %v1280_v32 = vadd.f32 1e-12, %v1264_v42  ;;  %v1256_v8 = vsub.f32 %v1224_v4, %v1240_v22 }
 0x2d8   : > { %1732 = vrsqrt.f32 %v1280_v32  ;;  %v1272_v47 = vmax.f32 %v1256_v8, 0.0 }
 0x2da   : > { %v1288_v48 = vadd.f32 1e-12, %v1272_v47 }
 0x2dc   : > { %1734 = vrsqrt.f32 %v1288_v48 }
 0x2e2   : > { %v1733_v51 = vpop.eup %1732 }
 0x2e3   : > { %v1328_v53 = vmul.f32 %v1733_v51, %v1312_v1 }
 0x2e5   : > { %v1351_v20 = vmul.f32 %v2800_v37, %v1328_v53 }
 0x2e6   : > { %v1735_v56 = vpop.eup %1734 }
 0x2e7   : > { %v1374_v58 = vadd.f32 %v2807_v43, %v1351_v20  ;;  %v1336_v60 = vmul.f32 %v1735_v56, %v1320_v52 }
 0x2e8   : > { %v1128_v0 = vpop.xlane.xlu1 %1127 }
 0x2e9   : > { %1390 = vst [vmem:[%s2820_s11 + $0x28] sm:$0xff] %v1374_v58  ;;  %v1359_v31 = vmul.f32 %v2800_v37, %v1336_v60  ;;  %v1201_v3 = vmul.f32 0.0078125, %v1128_v0 }
 0x2eb   : > { %v1382_v17 = vadd.f32 %v2807_v43, %v1359_v31  ;;  %v1233_v10 = vmul.f32 %v1201_v3, %v1201_v3  ;;  %v1313_v59 = vsub.f32 %v2772_v12, %v1201_v3 }
 0x2ec   : > { %v1144_v55 = vpop.xlane.xlu1 %1143 }
 0x2ed   : > { %1398 = vst [vmem:[%s2820_s11 + $0x68] sm:$0xff] %v1382_v17  ;;  %v1209_v39 = vmul.f32 0.0078125, %v1144_v55 }
 0x2ef   : > { %v1241_v35 = vmul.f32 %v1209_v39, %v1209_v39  ;;  %v1321_v45 = vsub.f32 %v2781_v13, %v1209_v39 }
 0x2f0   : > { %v1176_v34 = vpop.xlane.xlu1 %1175 }
 0x2f1   : > { %v1217_v30 = vmul.f32 0.0078125, %v1176_v34 }
 0x2f3   : > { %v1249_v41 = vsub.f32 %v1217_v30, %v1233_v10 }
 0x2f4   : > { %v1192_v63 = vpop.xlane.xlu1 %1191 }
 0x2f5   : > { %v1265_v29 = vmax.f32 %v1249_v41, 0.0  ;;  %v1225_v25 = vmul.f32 0.0078125, %v1192_v63 }
 0x2f6   : > { %v1130_v9 = vpop.xlane.xlu0 %1129 }
 0x2f7   : > { %v1281_v15 = vadd.f32 1e-12, %v1265_v29  ;;  %v1257_v57 = vsub.f32 %v1225_v25, %v1241_v35  ;;  %v1202_v61 = vmul.f32 0.0078125, %v1130_v9 }
 0x2f9   : > { %1736 = vrsqrt.f32 %v1281_v15  ;;  %v1273_v46 = vmax.f32 %v1257_v57, 0.0  ;;  %v1234_v7 = vmul.f32 %v1202_v61, %v1202_v61  ;;  %v1314_v13 = vsub.f32 %v2792_v62, %v1202_v61 }
 0x2fa   : > { %v1146_v49 = vpop.xlane.xlu0 %1145 }
 0x2fb   : > { %v1289_v18 = vadd.f32 1e-12, %v1273_v46  ;;  %v1210_v50 = vmul.f32 0.0078125, %v1146_v49 }
 0x2fd   : > { %1738 = vrsqrt.f32 %v1289_v18  ;;  %v1242_v27 = vmul.f32 %v1210_v50, %v1210_v50  ;;  %v1322_v4 = vsub.f32 %v2788_v14, %v1210_v50 }
 0x2fe   : > { %v1178_v24 = vpop.xlane.xlu0 %1177 }
 0x2ff   : > { %v1218_v23 = vmul.f32 0.0078125, %v1178_v24 }
 0x301   : > { %v1250_v21 = vsub.f32 %v1218_v23, %v1234_v7 }
 0x302   : > { %v1194_v26 = vpop.xlane.xlu0 %1193 }
 0x303   : > { %v1266_v11 = vmax.f32 %v1250_v21, 0.0  ;;  %v1226_v54 = vmul.f32 0.0078125, %v1194_v26  ;;  %v1737_v36 = vpop.eup %1736 }
 0x304   : > { %v1329_v28 = vmul.f32 %v1737_v36, %v1313_v59 }
 0x305   : > { %v1282_v2 = vadd.f32 1e-12, %v1266_v11  ;;  %v1258_v33 = vsub.f32 %v1226_v54, %v1242_v27 }
 0x306   : > { %v1352_v19 = vmul.f32 %v2800_v37, %v1329_v28 }
 0x307   : > { %1740 = vrsqrt.f32 %v1282_v2  ;;  %v1274_v40 = vmax.f32 %v1258_v33, 0.0  ;;  %v1739_v6 = vpop.eup %1738 }
 0x308   : > { %v1375_v5 = vadd.f32 %v2807_v43, %v1352_v19  ;;  %v1337_v12 = vmul.f32 %v1739_v6, %v1321_v45 }
 0x309   : > { %v1290_v16 = vadd.f32 1e-12, %v1274_v40 }
 0x30a   : > { %1391 = vst [vmem:[%s2820_s11 + $0x30] sm:$0xff] %v1375_v5  ;;  %v1360_v44 = vmul.f32 %v2800_v37, %v1337_v12 }
 0x30b   : > { %1742 = vrsqrt.f32 %v1290_v16 }
 0x30c   : > { %v1383_v38 = vadd.f32 %v2807_v43, %v1360_v44 }
 0x30e   : > { %1399 = vst [vmem:[%s2820_s11 + $0x70] sm:$0xff] %v1383_v38 }
 0x311   : > { %v1741_v22 = vpop.eup %1740 }
 0x312   : > { %v1330_v42 = vmul.f32 %v1741_v22, %v1314_v13 }
 0x314   : > { %v1353_v32 = vmul.f32 %v2800_v37, %v1330_v42 }
 0x315   : > { %v1743_v8 = vpop.eup %1742 }
 0x316   : > { %v1376_v47 = vadd.f32 %v2807_v43, %v1353_v32  ;;  %v1338_v48 = vmul.f32 %v1743_v8, %v1322_v4 }
 0x318   : > { %1392 = vst [vmem:[%s2820_s11 + $0x38] sm:$0xff] %v1376_v47  ;;  %v1361_v1 = vmul.f32 %v2800_v37, %v1338_v48 }
 0x31a   : > { %v1384_v14 = vadd.f32 %v2807_v43, %v1361_v1 }
 0x31c   : > { %1400 = vst [vmem:[%s2820_s11 + $0x78] sm:$0xff] %v1384_v14 }
 0x31d   : > { %1757 = shalt.err (!%p1754_p3)
}
 0x31e   : > { %s1758_s30 = scalar_lea.hbm %s2885_s22, 2048  ;;  %s1762_s7 = scalar_lea.hbm %s2938_s4, 4096 }
 0x31f   : > { %p1759_p4 = scmp.ne.s32.totalorder %s2885_s22, %s1758_s30  ;;  %p1763_p9 = scmp.lt.u32.totalorder %s2885_s22, %s2938_s4 }
 0x320   : > { %p1764_p10 = scmp.lt.u32.totalorder %s1762_s7, %s1758_s30  ;;  %p1766_p12 = scmp.lt.u32.totalorder %s1758_s30, %s2885_s22 }
 0x321   : > { %p1760_p7 = pnand %p1759_p4, %p1879_p5 }
 0x322   : > { %p1765_p11 = por %p1764_p10, %p1763_p9 }
 0x323   : > { %p1761_p8 = pneg %p1760_p7 }
 0x324   : > { %p1767_p13 = por %p1766_p12, %p1765_p11 }
 0x326   : > { %p1768_p0 = pnand %p1767_p13, %p1761_p8 }
 0x328   : > { %1771 = shalt.err (!%p1768_p0)
}
 0x329   : > { %s1814_s10 = smov 128   ;;  %s1815_s11 = smov 8  }
 0x32a   : > { %1620 = dma.vmem_to_hbm [thread:$0]  (%p1879_p5), %s2887_s13, 2048, %s2885_s22, %s2893_s23, %s1814_s10, %s1814_s10, %s1815_s11  }
 0x32b PF: > { %p1626_p1 = scmp.ge.s32.totalorder %s1806_s18, 2  ;;  %s1430_s12 = sand.u32 1, %s1794_s15  }
 0x32c   : > { %s1431_s14 = scalar_lea.sflag [#allocation3], %s1430_s12 }
 0x32d   : > { %p1623_p2 = pnand %p1626_p1, %p1883_p6 }
 0x32f   : > { %1789 = dma.done.wait (!%p1623_p2), %s1431_s14, 2048  }
 0x330   : > { %1791 = vsyncadd (!%p1623_p2), %s1431_s14, 4294965248  ;;  %p14_p3 = scmp.ge.s32.totalorder %s1866_s21, 4   ;;  %s2941_s15 = smov %s1798_s16 }
 0x331   : > { %s2942_s16 = smov %s1802_s17  ;;  %s2943_s17 = smov %s1877_s24 }
 0x332   : > { %s2944_s18 = smov %s1866_s21  ;;  %16 = sbr.rel (!%p14_p3) target bundleno = 3 (0x3), region = 71 }
 0x339   :  { %1436 = vsyncpa [#allocation3], 1 }
 0x33a   :  { %1438 = vsyncpa [#allocation3 + $0x1], 1 }

</bundles_post_ra>
